<compile_context>
chip_gen: v7x
topology: tpu7x:2x2x1
jax: 0.10.0
libtpu: 0.0.40
codegen_flags: <defaults>
</compile_context>

<pallas_src>
import functools

import jax
import jax.numpy as jnp
from jax.experimental import pallas as pl
from jax.experimental.pallas import tpu as pltpu


# ----------------------------- in-kernel helpers -----------------------------

def _layer_norm(x, gamma, beta, eps=1e-5):
    # x: (T, E) f32, gamma/beta: (1, E) — matches torch.nn.LayerNorm (biased var, eps=1e-5)
    mu = jnp.mean(x, axis=-1, keepdims=True)
    xc = x - mu
    var = jnp.mean(xc * xc, axis=-1, keepdims=True)
    return xc * jax.lax.rsqrt(var + eps) * gamma + beta


def _gelu_tanh(x):
    # tanh-approx GELU (routes the transcendental to the EUP slot).
    # |gelu_tanh - gelu_erf| < 1e-3 everywhere.
    c = 0.7978845608028654  # sqrt(2/pi)
    return 0.5 * x * (1.0 + jnp.tanh(c * (x + 0.044715 * x * x * x)))


def _mha(q, k, v, bias, wo, bo, *, heads, head_dim, nb, seq):
    """Multi-head attention on already-projected q/k/v.

    q/k/v: (nb*seq, heads*head_dim) f32. The 1/sqrt(head_dim) softmax scale is already
    folded into the Q projection weights, so no rescaling happens here.
    bias:  (seq, seq) f32 additive mask bias (0 => keep, -1e20 => masked), shared across
           batch and heads.
    wo:    (E, E) bf16 (x @ Wo.T layout), bo: (1, E) f32.

    Heads are gathered with static lane slices and leading-dim reshapes only (Mosaic-safe)
    and then processed in ONE (heads*nb)-batch einsum for scores / softmax / PV, so the
    MXU sees a single long vmatmul stream and softmax runs once over all heads.
    """
    bf = jnp.bfloat16
    qb, kb, vb = q.astype(bf), k.astype(bf), v.astype(bf)

    def split_heads(t):  # (T, E) bf16 -> (heads*nb, seq, head_dim); no sublane<->lane reshape
        per_head = [t[:, h * head_dim:(h + 1) * head_dim].reshape(nb, seq, head_dim)
                    for h in range(heads)]
        return jnp.stack(per_head, axis=0).reshape(heads * nb, seq, head_dim)

    qh, kh, vh = split_heads(qb), split_heads(kb), split_heads(vb)

    # One batched score matmul over every (head, batch) pair; f32 accumulation on the MXU.
    energy = jnp.einsum("bqd,bkd->bqk", qh, kh,
                        preferred_element_type=jnp.float32)          # (H*NB, L, L)
    energy = energy + bias                                           # additive mask, one add

    m = jnp.max(energy, axis=-1, keepdims=True)
    p = jnp.exp(energy - m)
    denom = jnp.sum(p, axis=-1, keepdims=True)
    probs = (p * pl.reciprocal(denom, approx=True)).astype(bf)       # EUP reciprocal

    ctx = jnp.einsum("bqk,bkd->bqd", probs, vh,
                     preferred_element_type=jnp.float32)             # (H*NB, L, Dh)
    ctx = ctx.reshape(heads, nb * seq, head_dim)                     # leading-dim reshape only
    o = jnp.concatenate([ctx[h] for h in range(heads)], axis=-1)     # (T, E), heads on lanes
    return jnp.dot(o.astype(bf), wo, preferred_element_type=jnp.float32) + bo


# --------------------------------- kernel ------------------------------------

def tempose_block_kernel(x_ref, val_ref, key_ref, bias_ref,
                         ln_ref,
                         wqkv1_ref, wo1_ref, bo1_ref,
                         wqkv2_ref, wo2_ref, bo2_ref,
                         w1_ref, b1_ref, w2_ref, b2_ref,
                         out_ref, *, heads, head_dim):
    nb, seq, E = x_ref.shape
    T = nb * seq
    bf = jnp.bfloat16

    x = x_ref[...].astype(jnp.float32).reshape(T, E)
    value = val_ref[...].astype(jnp.float32).reshape(T, E)
    key = key_ref[...].astype(jnp.float32).reshape(T, E)
    bias = bias_ref[...]                                          # (L, L) additive mask bias

    ln = ln_ref[...]                                              # (4, 2, E)
    g_norm, b_norm = ln[0, 0:1], ln[0, 1:2]
    g_pre1, b_pre1 = ln[1, 0:1], ln[1, 1:2]
    g_pre2, b_pre2 = ln[2, 0:1], ln[2, 1:2]
    g_ffn, b_ffn = ln[3, 0:1], ln[3, 1:2]

    # ---- block 1: norm -> self-attention -> residual (dropout/drop_path: identity, eval) ----
    xn = _layer_norm(x, g_norm, b_norm)
    xn_b = xn.astype(bf)                                          # cast hoisted, reused 3x
    q1 = jnp.dot(xn_b, wqkv1_ref[0], preferred_element_type=jnp.float32)   # Wq pre-scaled
    k1 = jnp.dot(xn_b, wqkv1_ref[1], preferred_element_type=jnp.float32)
    v1 = jnp.dot(xn_b, wqkv1_ref[2], preferred_element_type=jnp.float32)
    attn1 = _mha(q1, k1, v1, bias, wo1_ref[...], bo1_ref[...],
                 heads=heads, head_dim=head_dim, nb=nb, seq=seq)
    query = attn1 + xn

    # ---- TransformerBlock: prenorms -> cross-attention -> residual ----
    v_nb = _layer_norm(value, g_pre2, b_pre2).astype(bf)
    k_nb = _layer_norm(key, g_pre2, b_pre2).astype(bf)
    q_n = _layer_norm(query, g_pre1, b_pre1)
    q_nb = q_n.astype(bf)
    q2 = jnp.dot(q_nb, wqkv2_ref[0], preferred_element_type=jnp.float32)   # Wq pre-scaled
    k2 = jnp.dot(k_nb, wqkv2_ref[1], preferred_element_type=jnp.float32)
    v2 = jnp.dot(v_nb, wqkv2_ref[2], preferred_element_type=jnp.float32)
    attn2 = _mha(q2, k2, v2, bias, wo2_ref[...], bo2_ref[...],
                 heads=heads, head_dim=head_dim, nb=nb, seq=seq)
    x2 = attn2 + q_n

    # ---- feed_forward: LayerNorm -> Linear -> GELU -> Linear, residual ----
    h = _layer_norm(x2, g_ffn, b_ffn).astype(bf)
    h = jnp.dot(h, w1_ref[...], preferred_element_type=jnp.float32) + b1_ref[...]
    h = _gelu_tanh(h).astype(bf)                                  # bf16 hidden: halves (T,FE)
    h = jnp.dot(h, w2_ref[...], preferred_element_type=jnp.float32) + b2_ref[...]

    out_ref[...] = (h + x2).reshape(nb, seq, E).astype(out_ref.dtype)


# --------------------------------- wrapper -----------------------------------

def _pick_batch_block(N, L, E, FE):
    """Pick the batch tile NB.

    Targets: >=2 grid steps whenever N >= 2 (software pipelining + both v7x TensorCores
    via the 'parallel' batch axis), while keeping the per-step live set — dominated by
    the (NB*L, FE) FFN hidden plus ~a dozen (NB*L, E) f32 intermediates and the
    double-buffered activation blocks — well inside the v7x 64 MiB VMEM budget."""
    slab_budget = 24 * 1024 * 1024                         # conservative per-step budget
    per_sample = 4 * L * (2 * FE + 16 * E)                 # rough f32 bytes live per batch row
    nb = max(1, min(N, slab_budget // max(per_sample, 1)))
    if N >= 2:
        nb = min(nb, max(1, N // 2))                       # at least 2 grid steps
    while N % nb:                                          # keep the grid exact
        nb -= 1
    return max(nb, 1)


def tempose_block_pallas(x, value, key, mask, kp, *, heads, batch_block=None):
    """x/value/key: (N, L, E); mask: (L, L) (0 => masked, shared across batch).

    kp: dict of kernel-packed parameters (see pack_params). Returns (N, L, E) f32."""
    N, L, E = x.shape
    assert E % heads == 0
    head_dim = E // heads
    FE = kp["w1"].shape[1]
    NB = _pick_batch_block(N, L, E, FE) if batch_block is None else batch_block
    assert N % NB == 0

    # Additive mask bias, precomputed once outside the kernel (feedback: hoist the
    # O(heads*NB*L*L) compare/select out of the attend path).
    bias = jnp.where(mask == 0.0, jnp.float32(-1e20), jnp.float32(0.0))

    batch3 = lambda i: (i, 0, 0)
    const = lambda nd: (lambda i, _nd=nd: (0,) * _nd)

    grid_spec = pltpu.PrefetchScalarGridSpec(
        num_scalar_prefetch=0,
        grid=(N // NB,),
        in_specs=[
            pl.BlockSpec((NB, L, E), batch3),                 # x
            pl.BlockSpec((NB, L, E), batch3),                 # value
            pl.BlockSpec((NB, L, E), batch3),                 # key
            pl.BlockSpec((L, L), const(2)),                   # additive mask bias (batch-invariant)
            pl.BlockSpec((4, 2, E), const(3)),                # stacked LayerNorm params (f32)
            pl.BlockSpec((3, E, E), const(3)),                # attn1 Wq/Wk/Wv (bf16, Wq pre-scaled)
            pl.BlockSpec((E, E), const(2)),                   # attn1 Wo (bf16)
            pl.BlockSpec((1, E), const(2)),                   # attn1 fc_out bias (f32)
            pl.BlockSpec((3, E, E), const(3)),                # attn2 Wq/Wk/Wv (bf16, Wq pre-scaled)
            pl.BlockSpec((E, E), const(2)),                   # attn2 Wo (bf16)
            pl.BlockSpec((1, E), const(2)),                   # attn2 fc_out bias (f32)
            pl.BlockSpec((E, FE), const(2)),                  # ffn W1 (bf16, x@W layout)
            pl.BlockSpec((1, FE), const(2)),                  # ffn b1 (f32)
            pl.BlockSpec((FE, E), const(2)),                  # ffn W2 (bf16)
            pl.BlockSpec((1, E), const(2)),                   # ffn b2 (f32)
        ],
        out_specs=pl.BlockSpec((NB, L, E), batch3),
    )

    operands = (x, value, key, bias,
                kp["ln"], kp["wqkv1"], kp["wo1"], kp["bo1"],
                kp["wqkv2"], kp["wo2"], kp["bo2"],
                kp["w1"], kp["b1"], kp["w2"], kp["b2"])

    # Cost estimate recomputed for the tiled grid: activations stream once per call,
    # constant operands are (conservatively) counted once per grid step.
    steps = N // NB
    act_bytes = sum(int(a.size) * a.dtype.itemsize for a in (x, value, key)) + N * L * E * 4
    const_bytes = sum(int(a.size) * a.dtype.itemsize for a in operands[3:])
    flops = int(N * L * (16 * E * E + 8 * L * E + 4 * E * FE))
    transcendentals = int(N * L * (2 * heads * L + FE + 8))

    kernel = functools.partial(tempose_block_kernel, heads=heads, head_dim=head_dim)
    return pl.pallas_call(
        kernel,
        out_shape=jax.ShapeDtypeStruct((N, L, E), jnp.float32),
        grid_spec=grid_spec,
        compiler_params=pltpu.CompilerParams(
            dimension_semantics=("parallel",),
            vmem_limit_bytes=48 * 1024 * 1024,              # headroom below v7x's 64 MiB
        ),
        cost_estimate=pl.CostEstimate(flops=flops, transcendentals=transcendentals,
                                      bytes_accessed=int(act_bytes + const_bytes * steps)),
    )(*operands)


# ----------------------- parameter init (PyTorch shapes) ----------------------

def init_params(key, E, heads, forward_expansion):
    FE = forward_expansion * E
    ks = jax.random.split(key, 24)
    n = lambda i, shape, s=0.08: (s * jax.random.normal(ks[i], shape)).astype(jnp.float32)
    g = lambda i: (1.0 + 0.05 * jax.random.normal(ks[i], (E,))).astype(jnp.float32)
    b = lambda i: (0.05 * jax.random.normal(ks[i], (E,))).astype(jnp.float32)

    return dict(
        # pre-self-attention norm
        norm_g=g(0), norm_b=b(1),
        # self-attention
        a1_Wv=n(2, (E, E)), a1_Wk=n(3, (E, E)), a1_Wq=n(4, (E, E)),
        a1_Wo=n(5, (E, E)), a1_bo=n(6, (E,)),
        # TransformerBlock prenorms
        pre1_g=g(7), pre1_b=b(8), pre2_g=g(9), pre2_b=b(10),
        # TransformerBlock.attention (cross-attn)
        a2_Wv=n(11, (E, E)), a2_Wk=n(12, (E, E)), a2_Wq=n(13, (E, E)),
        a2_Wo=n(14, (E, E)), a2_bo=n(15, (E,)),
        # feed_forward: LayerNorm, Linear(E,FE), GELU, Linear(FE,E)
        ffn_g=g(16), ffn_b=b(17),
        W1=n(18, (FE, E)), b1=n(19, (FE,)),
        W2=n(20, (E, FE)), b2=n(21, (E,)),
    )


def pack_params(p, E, heads):
    bf = jnp.bfloat16
    head_dim = E // heads
    scale = 1.0 / float(head_dim) ** 0.5
    # torch Linear weight is (out, in): y = x @ W.T.  Q/K/V are stacked (3, E, E) so the
    # kernel runs three lane-aligned (T,E)@(E,E) matmuls (no sub-128-lane column slicing
    # of a fused (T,3E) projection).  Head h of each projection occupies output columns
    # [h*Dh, (h+1)*Dh), matching the reshape(N, L, heads, head_dim) split in PyTorch.
    # The 1/sqrt(head_dim) softmax scale is folded into the Q weights.
    wqkv1 = jnp.stack([(scale * p["a1_Wq"]).T, p["a1_Wk"].T, p["a1_Wv"].T])   # (3, E, E)
    wqkv2 = jnp.stack([(scale * p["a2_Wq"]).T, p["a2_Wk"].T, p["a2_Wv"].T])   # (3, E, E)
    return dict(
        ln=jnp.stack([
            jnp.stack([p["norm_g"], p["norm_b"]]),
            jnp.stack([p["pre1_g"], p["pre1_b"]]),
            jnp.stack([p["pre2_g"], p["pre2_b"]]),
            jnp.stack([p["ffn_g"], p["ffn_b"]]),
        ]).astype(jnp.float32),                                   # (4, 2, E)
        wqkv1=wqkv1.astype(bf),
        wo1=p["a1_Wo"].T.astype(bf), bo1=p["a1_bo"].reshape(1, E).astype(jnp.float32),
        wqkv2=wqkv2.astype(bf),
        wo2=p["a2_Wo"].T.astype(bf), bo2=p["a2_bo"].reshape(1, E).astype(jnp.float32),
        w1=p["W1"].T.astype(bf), b1=p["b1"].reshape(1, -1).astype(jnp.float32),
        w2=p["W2"].T.astype(bf), b2=p["b2"].reshape(1, -1).astype(jnp.float32),
    )


# ------------------------- pure-JAX reference (checking) ----------------------

def reference_block(x, value, key, mask, p, heads):
    N, L, E = x.shape
    Dh = E // heads

    def ln(t, g, b, eps=1e-5):
        mu = t.mean(-1, keepdims=True)
        var = ((t - mu) ** 2).mean(-1, keepdims=True)
        return (t - mu) / jnp.sqrt(var + eps) * g + b

    def sa(values, keys, query, Wv, Wk, Wq, Wo, bo):
        v = (values @ Wv.T).reshape(N, L, heads, Dh)
        k = (keys @ Wk.T).reshape(N, L, heads, Dh)
        q = (query @ Wq.T).reshape(N, L, heads, Dh)
        energy = jnp.einsum("nqhd,nkhd->nhqk", q, k)
        energy = jnp.where(mask[None, None] == 0, -1e20, energy)
        attn = jax.nn.softmax(energy / Dh ** 0.5, axis=3)
        out = jnp.einsum("nhql,nlhd->nqhd", attn, v).reshape(N, L, E)
        return out @ Wo.T + bo

    xn = ln(x, p["norm_g"], p["norm_b"])
    attn1 = sa(xn, xn, xn, p["a1_Wv"], p["a1_Wk"], p["a1_Wq"], p["a1_Wo"], p["a1_bo"])
    query = attn1 + xn
    vn = ln(value, p["pre2_g"], p["pre2_b"])
    kn = ln(key, p["pre2_g"], p["pre2_b"])
    qn = ln(query, p["pre1_g"], p["pre1_b"])
    attn2 = sa(vn, kn, qn, p["a2_Wv"], p["a2_Wk"], p["a2_Wq"], p["a2_Wo"], p["a2_bo"])
    x2 = attn2 + qn
    h = ln(x2, p["ffn_g"], p["ffn_b"])
    h = h @ p["W1"].T + p["b1"]
    h = 0.5 * h * (1.0 + jax.scipy.special.erf(h / jnp.sqrt(2.0)))   # exact erf-GELU
    h = h @ p["W2"].T + p["b2"]
    return h + x2


# ----------------------------------- main -------------------------------------

if __name__ == "__main__":
    N, L, E = 2, 8, 32
    heads, forward_expansion = 4, 4

    root = jax.random.PRNGKey(0)
    k_x, k_v, k_k, k_p = jax.random.split(root, 4)
    x = jax.random.normal(k_x, (N, L, E), jnp.float32)
    value = jax.random.normal(k_v, (N, L, E), jnp.float32)
    key_in = jax.random.normal(k_k, (N, L, E), jnp.float32)

    # Causal mask, shared across batch (0 => masked, matches masked_fill(mask == 0, -1e20)).
    mask = jnp.tril(jnp.ones((L, L), jnp.float32))

    params = init_params(k_p, E, heads, forward_expansion)
    kparams = pack_params(params, E, heads)

    out = tempose_block_pallas(x, value, key_in, mask, kparams, heads=heads)
    out = jax.block_until_ready(out)

    with jax.default_matmul_precision("highest"):
        ref = reference_block(x, value, key_in, mask, params, heads)

    # bf16 matmul operands + tanh-GELU + approx reciprocal => slightly looser tolerance
    # than the all-f32 version (accumulation, LayerNorms and residuals remain f32).
    err = float(jnp.max(jnp.abs(out - ref)))
    assert err < 5e-2, f"mismatch vs reference: max abs err = {err}"

    print("KERNEL_OK")
</pallas_src>

<mosaic_0001>
module attributes {stable_mosaic.version = 11 : i64} {
  func.func @tempose_block_kernel(%arg0: i32, %arg1: memref<1x8x32xf32, #tpu.memory_space<vmem>>, %arg2: memref<1x8x32xf32, #tpu.memory_space<vmem>>, %arg3: memref<1x8x32xf32, #tpu.memory_space<vmem>>, %arg4: memref<8x8xf32, #tpu.memory_space<vmem>>, %arg5: memref<4x2x32xf32, #tpu.memory_space<vmem>>, %arg6: memref<3x32x32xbf16, #tpu.memory_space<vmem>>, %arg7: memref<32x32xbf16, #tpu.memory_space<vmem>>, %arg8: memref<1x32xf32, #tpu.memory_space<vmem>>, %arg9: memref<3x32x32xbf16, #tpu.memory_space<vmem>>, %arg10: memref<32x32xbf16, #tpu.memory_space<vmem>>, %arg11: memref<1x32xf32, #tpu.memory_space<vmem>>, %arg12: memref<32x128xbf16, #tpu.memory_space<vmem>>, %arg13: memref<1x128xf32, #tpu.memory_space<vmem>>, %arg14: memref<128x32xbf16, #tpu.memory_space<vmem>>, %arg15: memref<1x32xf32, #tpu.memory_space<vmem>>, %arg16: memref<1x8x32xf32, #tpu.memory_space<vmem>>) attributes {dimension_semantics = [#tpu.dimension_semantics<parallel>], iteration_bounds = array<i64: 2>, scalar_prefetch = 0 : i64, scratch_operands = 0 : i64, tpu.core_type = #tpu.core_type<tc>, window_params = [{transform_indices = @transform_0, window_bounds = array<i64: 1, 8, 32>}, {transform_indices = @transform_1, window_bounds = array<i64: 1, 8, 32>}, {transform_indices = @transform_2, window_bounds = array<i64: 1, 8, 32>}, {pipeline_mode = #tpu.pipeline_mode<synchronous>, transform_indices = @transform_3, window_bounds = array<i64: 8, 8>}, {pipeline_mode = #tpu.pipeline_mode<synchronous>, transform_indices = @transform_4, window_bounds = array<i64: 4, 2, 32>}, {pipeline_mode = #tpu.pipeline_mode<synchronous>, transform_indices = @transform_5, window_bounds = array<i64: 3, 32, 32>}, {pipeline_mode = #tpu.pipeline_mode<synchronous>, transform_indices = @transform_6, window_bounds = array<i64: 32, 32>}, {pipeline_mode = #tpu.pipeline_mode<synchronous>, transform_indices = @transform_7, window_bounds = array<i64: 1, 32>}, {pipeline_mode = #tpu.pipeline_mode<synchronous>, transform_indices = @transform_8, window_bounds = array<i64: 3, 32, 32>}, {pipeline_mode = #tpu.pipeline_mode<synchronous>, transform_indices = @transform_9, window_bounds = array<i64: 32, 32>}, {pipeline_mode = #tpu.pipeline_mode<synchronous>, transform_indices = @transform_10, window_bounds = array<i64: 1, 32>}, {pipeline_mode = #tpu.pipeline_mode<synchronous>, transform_indices = @transform_11, window_bounds = array<i64: 32, 128>}, {pipeline_mode = #tpu.pipeline_mode<synchronous>, transform_indices = @transform_12, window_bounds = array<i64: 1, 128>}, {pipeline_mode = #tpu.pipeline_mode<synchronous>, transform_indices = @transform_13, window_bounds = array<i64: 128, 32>}, {pipeline_mode = #tpu.pipeline_mode<synchronous>, transform_indices = @transform_14, window_bounds = array<i64: 1, 32>}, {transform_indices = @transform_15, window_bounds = array<i64: 1, 8, 32>}]} {
    %c0 = arith.constant 0 : index
    %c0_0 = arith.constant 0 : index
    %c0_1 = arith.constant 0 : index
    %0 = vector.load %arg1[%c0, %c0_0, %c0_1] : memref<1x8x32xf32, #tpu.memory_space<vmem>>, vector<1x8x32xf32>
    %1 = vector.shape_cast %0 : vector<1x8x32xf32> to vector<8x32xf32>
    %c0_2 = arith.constant 0 : index
    %c0_3 = arith.constant 0 : index
    %c0_4 = arith.constant 0 : index
    %2 = vector.load %arg2[%c0_2, %c0_3, %c0_4] : memref<1x8x32xf32, #tpu.memory_space<vmem>>, vector<1x8x32xf32>
    %3 = vector.shape_cast %2 : vector<1x8x32xf32> to vector<8x32xf32>
    %c0_5 = arith.constant 0 : index
    %c0_6 = arith.constant 0 : index
    %c0_7 = arith.constant 0 : index
    %4 = vector.load %arg3[%c0_5, %c0_6, %c0_7] : memref<1x8x32xf32, #tpu.memory_space<vmem>>, vector<1x8x32xf32>
    %5 = vector.shape_cast %4 : vector<1x8x32xf32> to vector<8x32xf32>
    %c0_8 = arith.constant 0 : index
    %c0_9 = arith.constant 0 : index
    %6 = vector.load %arg4[%c0_8, %c0_9] : memref<8x8xf32, #tpu.memory_space<vmem>>, vector<8x8xf32>
    %c0_10 = arith.constant 0 : index
    %c0_11 = arith.constant 0 : index
    %c0_12 = arith.constant 0 : index
    %7 = vector.load %arg5[%c0_10, %c0_11, %c0_12] : memref<4x2x32xf32, #tpu.memory_space<vmem>>, vector<4x2x32xf32>
    %8 = vector.extract_strided_slice %7 {offsets = [0, 0, 0], sizes = [1, 1, 32], strides = [1, 1, 1]} : vector<4x2x32xf32> to vector<1x1x32xf32>
    %9 = vector.shape_cast %8 : vector<1x1x32xf32> to vector<1x32xf32>
    %10 = vector.extract_strided_slice %7 {offsets = [0, 1, 0], sizes = [1, 1, 32], strides = [1, 1, 1]} : vector<4x2x32xf32> to vector<1x1x32xf32>
    %11 = vector.shape_cast %10 : vector<1x1x32xf32> to vector<1x32xf32>
    %12 = vector.extract_strided_slice %7 {offsets = [1, 0, 0], sizes = [1, 1, 32], strides = [1, 1, 1]} : vector<4x2x32xf32> to vector<1x1x32xf32>
    %13 = vector.shape_cast %12 : vector<1x1x32xf32> to vector<1x32xf32>
    %14 = vector.extract_strided_slice %7 {offsets = [1, 1, 0], sizes = [1, 1, 32], strides = [1, 1, 1]} : vector<4x2x32xf32> to vector<1x1x32xf32>
    %15 = vector.shape_cast %14 : vector<1x1x32xf32> to vector<1x32xf32>
    %16 = vector.extract_strided_slice %7 {offsets = [2, 0, 0], sizes = [1, 1, 32], strides = [1, 1, 1]} : vector<4x2x32xf32> to vector<1x1x32xf32>
    %17 = vector.shape_cast %16 : vector<1x1x32xf32> to vector<1x32xf32>
    %18 = vector.extract_strided_slice %7 {offsets = [2, 1, 0], sizes = [1, 1, 32], strides = [1, 1, 1]} : vector<4x2x32xf32> to vector<1x1x32xf32>
    %19 = vector.shape_cast %18 : vector<1x1x32xf32> to vector<1x32xf32>
    %20 = vector.extract_strided_slice %7 {offsets = [3, 0, 0], sizes = [1, 1, 32], strides = [1, 1, 1]} : vector<4x2x32xf32> to vector<1x1x32xf32>
    %21 = vector.shape_cast %20 : vector<1x1x32xf32> to vector<1x32xf32>
    %22 = vector.extract_strided_slice %7 {offsets = [3, 1, 0], sizes = [1, 1, 32], strides = [1, 1, 1]} : vector<4x2x32xf32> to vector<1x1x32xf32>
    %23 = vector.shape_cast %22 : vector<1x1x32xf32> to vector<1x32xf32>
    %cst = arith.constant dense<0.000000e+00> : vector<8xf32>
    %24 = vector.multi_reduction <add>, %1, %cst [1] : vector<8x32xf32> to vector<8xf32>
    %25 = vector.shape_cast %24 : vector<8xf32> to vector<8x1xf32>
    %cst_13 = arith.constant 3.200000e+01 : f32
    %26 = vector.broadcast %cst_13 : f32 to vector<8x1xf32>
    %27 = arith.divf %25, %26 : vector<8x1xf32>
    %28 = vector.broadcast %27 : vector<8x1xf32> to vector<8x32xf32>
    %29 = arith.subf %1, %28 : vector<8x32xf32>
    %30 = arith.mulf %29, %29 : vector<8x32xf32>
    %cst_14 = arith.constant dense<0.000000e+00> : vector<8xf32>
    %31 = vector.multi_reduction <add>, %30, %cst_14 [1] : vector<8x32xf32> to vector<8xf32>
    %32 = vector.shape_cast %31 : vector<8xf32> to vector<8x1xf32>
    %cst_15 = arith.constant 3.200000e+01 : f32
    %33 = vector.broadcast %cst_15 : f32 to vector<8x1xf32>
    %34 = arith.divf %32, %33 : vector<8x1xf32>
    %cst_16 = arith.constant 9.99999974E-6 : f32
    %35 = vector.broadcast %cst_16 : f32 to vector<8x1xf32>
    %36 = arith.addf %34, %35 : vector<8x1xf32>
    %37 = math.rsqrt %36 : vector<8x1xf32>
    %38 = vector.broadcast %37 : vector<8x1xf32> to vector<8x32xf32>
    %39 = arith.mulf %29, %38 : vector<8x32xf32>
    %40 = vector.broadcast %9 : vector<1x32xf32> to vector<8x32xf32>
    %41 = arith.mulf %39, %40 : vector<8x32xf32>
    %42 = vector.broadcast %11 : vector<1x32xf32> to vector<8x32xf32>
    %43 = arith.addf %41, %42 : vector<8x32xf32>
    %44 = arith.truncf %43 : vector<8x32xf32> to vector<8x32xbf16>
    %c0_17 = arith.constant 0 : index
    %c0_18 = arith.constant 0 : index
    %c0_19 = arith.constant 0 : index
    %45 = vector.load %arg6[%c0_17, %c0_18, %c0_19] : memref<3x32x32xbf16, #tpu.memory_space<vmem>>, vector<1x32x32xbf16>
    %46 = vector.shape_cast %45 : vector<1x32x32xbf16> to vector<32x32xbf16>
    %cst_20 = arith.constant dense<0.000000e+00> : vector<8x32xf32>
    %47 = tpu.matmul %44, %46, %cst_20 {dimension_numbers = #tpu.dot_dimension_numbers<[1], [0], [0], [1], [0, 0, 1, 1], [], []>} : vector<8x32xbf16>, vector<32x32xbf16>, vector<8x32xf32> -> vector<8x32xf32>
    %c1 = arith.constant 1 : index
    %c0_21 = arith.constant 0 : index
    %c0_22 = arith.constant 0 : index
    %48 = vector.load %arg6[%c1, %c0_21, %c0_22] : memref<3x32x32xbf16, #tpu.memory_space<vmem>>, vector<1x32x32xbf16>
    %49 = vector.shape_cast %48 : vector<1x32x32xbf16> to vector<32x32xbf16>
    %cst_23 = arith.constant dense<0.000000e+00> : vector<8x32xf32>
    %50 = tpu.matmul %44, %49, %cst_23 {dimension_numbers = #tpu.dot_dimension_numbers<[1], [0], [0], [1], [0, 0, 1, 1], [], []>} : vector<8x32xbf16>, vector<32x32xbf16>, vector<8x32xf32> -> vector<8x32xf32>
    %c2 = arith.constant 2 : index
    %c0_24 = arith.constant 0 : index
    %c0_25 = arith.constant 0 : index
    %51 = vector.load %arg6[%c2, %c0_24, %c0_25] : memref<3x32x32xbf16, #tpu.memory_space<vmem>>, vector<1x32x32xbf16>
    %52 = vector.shape_cast %51 : vector<1x32x32xbf16> to vector<32x32xbf16>
    %cst_26 = arith.constant dense<0.000000e+00> : vector<8x32xf32>
    %53 = tpu.matmul %44, %52, %cst_26 {dimension_numbers = #tpu.dot_dimension_numbers<[1], [0], [0], [1], [0, 0, 1, 1], [], []>} : vector<8x32xbf16>, vector<32x32xbf16>, vector<8x32xf32> -> vector<8x32xf32>
    %c0_27 = arith.constant 0 : index
    %c0_28 = arith.constant 0 : index
    %54 = vector.load %arg7[%c0_27, %c0_28] : memref<32x32xbf16, #tpu.memory_space<vmem>>, vector<32x32xbf16>
    %c0_29 = arith.constant 0 : index
    %c0_30 = arith.constant 0 : index
    %55 = vector.load %arg8[%c0_29, %c0_30] : memref<1x32xf32, #tpu.memory_space<vmem>>, vector<1x32xf32>
    %56 = arith.truncf %47 : vector<8x32xf32> to vector<8x32xbf16>
    %57 = arith.truncf %50 : vector<8x32xf32> to vector<8x32xbf16>
    %58 = arith.truncf %53 : vector<8x32xf32> to vector<8x32xbf16>
    %59 = vector.extract_strided_slice %56 {offsets = [0, 0], sizes = [8, 8], strides = [1, 1]} : vector<8x32xbf16> to vector<8x8xbf16>
    %60 = vector.shape_cast %59 : vector<8x8xbf16> to vector<1x8x8xbf16>
    %61 = vector.extract_strided_slice %56 {offsets = [0, 8], sizes = [8, 8], strides = [1, 1]} : vector<8x32xbf16> to vector<8x8xbf16>
    %62 = vector.shape_cast %61 : vector<8x8xbf16> to vector<1x8x8xbf16>
    %63 = vector.extract_strided_slice %56 {offsets = [0, 16], sizes = [8, 8], strides = [1, 1]} : vector<8x32xbf16> to vector<8x8xbf16>
    %64 = vector.shape_cast %63 : vector<8x8xbf16> to vector<1x8x8xbf16>
    %65 = vector.extract_strided_slice %56 {offsets = [0, 24], sizes = [8, 8], strides = [1, 1]} : vector<8x32xbf16> to vector<8x8xbf16>
    %66 = vector.shape_cast %65 : vector<8x8xbf16> to vector<1x8x8xbf16>
    %67 = vector.shape_cast %60 : vector<1x8x8xbf16> to vector<1x1x8x8xbf16>
    %68 = vector.shape_cast %62 : vector<1x8x8xbf16> to vector<1x1x8x8xbf16>
    %69 = vector.shape_cast %64 : vector<1x8x8xbf16> to vector<1x1x8x8xbf16>
    %70 = vector.shape_cast %66 : vector<1x8x8xbf16> to vector<1x1x8x8xbf16>
    %71 = tpu.concatenate %67, %68, %69, %70 in 0 : vector<1x1x8x8xbf16>, vector<1x1x8x8xbf16>, vector<1x1x8x8xbf16>, vector<1x1x8x8xbf16> -> vector<4x1x8x8xbf16>
    %72 = vector.shape_cast %71 : vector<4x1x8x8xbf16> to vector<4x8x8xbf16>
    %73 = vector.extract_strided_slice %57 {offsets = [0, 0], sizes = [8, 8], strides = [1, 1]} : vector<8x32xbf16> to vector<8x8xbf16>
    %74 = vector.shape_cast %73 : vector<8x8xbf16> to vector<1x8x8xbf16>
    %75 = vector.extract_strided_slice %57 {offsets = [0, 8], sizes = [8, 8], strides = [1, 1]} : vector<8x32xbf16> to vector<8x8xbf16>
    %76 = vector.shape_cast %75 : vector<8x8xbf16> to vector<1x8x8xbf16>
    %77 = vector.extract_strided_slice %57 {offsets = [0, 16], sizes = [8, 8], strides = [1, 1]} : vector<8x32xbf16> to vector<8x8xbf16>
    %78 = vector.shape_cast %77 : vector<8x8xbf16> to vector<1x8x8xbf16>
    %79 = vector.extract_strided_slice %57 {offsets = [0, 24], sizes = [8, 8], strides = [1, 1]} : vector<8x32xbf16> to vector<8x8xbf16>
    %80 = vector.shape_cast %79 : vector<8x8xbf16> to vector<1x8x8xbf16>
    %81 = vector.shape_cast %74 : vector<1x8x8xbf16> to vector<1x1x8x8xbf16>
    %82 = vector.shape_cast %76 : vector<1x8x8xbf16> to vector<1x1x8x8xbf16>
    %83 = vector.shape_cast %78 : vector<1x8x8xbf16> to vector<1x1x8x8xbf16>
    %84 = vector.shape_cast %80 : vector<1x8x8xbf16> to vector<1x1x8x8xbf16>
    %85 = tpu.concatenate %81, %82, %83, %84 in 0 : vector<1x1x8x8xbf16>, vector<1x1x8x8xbf16>, vector<1x1x8x8xbf16>, vector<1x1x8x8xbf16> -> vector<4x1x8x8xbf16>
    %86 = vector.shape_cast %85 : vector<4x1x8x8xbf16> to vector<4x8x8xbf16>
    %87 = vector.extract_strided_slice %58 {offsets = [0, 0], sizes = [8, 8], strides = [1, 1]} : vector<8x32xbf16> to vector<8x8xbf16>
    %88 = vector.shape_cast %87 : vector<8x8xbf16> to vector<1x8x8xbf16>
    %89 = vector.extract_strided_slice %58 {offsets = [0, 8], sizes = [8, 8], strides = [1, 1]} : vector<8x32xbf16> to vector<8x8xbf16>
    %90 = vector.shape_cast %89 : vector<8x8xbf16> to vector<1x8x8xbf16>
    %91 = vector.extract_strided_slice %58 {offsets = [0, 16], sizes = [8, 8], strides = [1, 1]} : vector<8x32xbf16> to vector<8x8xbf16>
    %92 = vector.shape_cast %91 : vector<8x8xbf16> to vector<1x8x8xbf16>
    %93 = vector.extract_strided_slice %58 {offsets = [0, 24], sizes = [8, 8], strides = [1, 1]} : vector<8x32xbf16> to vector<8x8xbf16>
    %94 = vector.shape_cast %93 : vector<8x8xbf16> to vector<1x8x8xbf16>
    %95 = vector.shape_cast %88 : vector<1x8x8xbf16> to vector<1x1x8x8xbf16>
    %96 = vector.shape_cast %90 : vector<1x8x8xbf16> to vector<1x1x8x8xbf16>
    %97 = vector.shape_cast %92 : vector<1x8x8xbf16> to vector<1x1x8x8xbf16>
    %98 = vector.shape_cast %94 : vector<1x8x8xbf16> to vector<1x1x8x8xbf16>
    %99 = tpu.concatenate %95, %96, %97, %98 in 0 : vector<1x1x8x8xbf16>, vector<1x1x8x8xbf16>, vector<1x1x8x8xbf16>, vector<1x1x8x8xbf16> -> vector<4x1x8x8xbf16>
    %100 = vector.shape_cast %99 : vector<4x1x8x8xbf16> to vector<4x8x8xbf16>
    "tpu.trace_start"() <{level = 10 : i32, message = "bqd,bkd->bqk"}> : () -> ()
    %cst_31 = arith.constant dense<0.000000e+00> : vector<4x8x8xf32>
    %101 = tpu.matmul %72, %86, %cst_31 {dimension_numbers = #tpu.dot_dimension_numbers<[2], [2], [1], [1], [0, 0, 0, 1, 1, 1], [0], [0]>} : vector<4x8x8xbf16>, vector<4x8x8xbf16>, vector<4x8x8xf32> -> vector<4x8x8xf32>
    "tpu.trace_stop"() : () -> ()
    %102 = vector.shape_cast %6 : vector<8x8xf32> to vector<1x8x8xf32>
    %103 = vector.broadcast %102 : vector<1x8x8xf32> to vector<4x8x8xf32>
    %104 = arith.addf %101, %103 : vector<4x8x8xf32>
    %cst_32 = arith.constant dense<0xFF800000> : vector<4x8xf32>
    %105 = vector.multi_reduction <maximumf>, %104, %cst_32 [2] : vector<4x8x8xf32> to vector<4x8xf32>
    %106 = vector.shape_cast %105 : vector<4x8xf32> to vector<4x8x1xf32>
    %107 = vector.broadcast %106 : vector<4x8x1xf32> to vector<4x8x8xf32>
    %108 = arith.subf %104, %107 : vector<4x8x8xf32>
    %109 = math.exp %108 : vector<4x8x8xf32>
    %cst_33 = arith.constant dense<0.000000e+00> : vector<4x8xf32>
    %110 = vector.multi_reduction <add>, %109, %cst_33 [2] : vector<4x8x8xf32> to vector<4x8xf32>
    %111 = vector.shape_cast %110 : vector<4x8xf32> to vector<4x8x1xf32>
    %112 = tpu.reciprocal %111 {approx = true} : vector<4x8x1xf32> -> vector<4x8x1xf32>
    %113 = vector.broadcast %112 : vector<4x8x1xf32> to vector<4x8x8xf32>
    %114 = arith.mulf %109, %113 : vector<4x8x8xf32>
    %115 = arith.truncf %114 : vector<4x8x8xf32> to vector<4x8x8xbf16>
    "tpu.trace_start"() <{level = 10 : i32, message = "bqk,bkd->bqd"}> : () -> ()
    %cst_34 = arith.constant dense<0.000000e+00> : vector<4x8x8xf32>
    %116 = tpu.matmul %115, %100, %cst_34 {dimension_numbers = #tpu.dot_dimension_numbers<[2], [1], [1], [2], [0, 0, 0, 1, 1, 2], [0], [0]>} : vector<4x8x8xbf16>, vector<4x8x8xbf16>, vector<4x8x8xf32> -> vector<4x8x8xf32>
    "tpu.trace_stop"() : () -> ()
    %117 = vector.extract_strided_slice %116 {offsets = [0, 0, 0], sizes = [1, 8, 8], strides = [1, 1, 1]} : vector<4x8x8xf32> to vector<1x8x8xf32>
    %118 = vector.shape_cast %117 : vector<1x8x8xf32> to vector<8x8xf32>
    %119 = vector.extract_strided_slice %116 {offsets = [1, 0, 0], sizes = [1, 8, 8], strides = [1, 1, 1]} : vector<4x8x8xf32> to vector<1x8x8xf32>
    %120 = vector.shape_cast %119 : vector<1x8x8xf32> to vector<8x8xf32>
    %121 = vector.extract_strided_slice %116 {offsets = [2, 0, 0], sizes = [1, 8, 8], strides = [1, 1, 1]} : vector<4x8x8xf32> to vector<1x8x8xf32>
    %122 = vector.shape_cast %121 : vector<1x8x8xf32> to vector<8x8xf32>
    %123 = vector.extract_strided_slice %116 {offsets = [3, 0, 0], sizes = [1, 8, 8], strides = [1, 1, 1]} : vector<4x8x8xf32> to vector<1x8x8xf32>
    %124 = vector.shape_cast %123 : vector<1x8x8xf32> to vector<8x8xf32>
    %125 = tpu.concatenate %118, %120, %122, %124 in 1 : vector<8x8xf32>, vector<8x8xf32>, vector<8x8xf32>, vector<8x8xf32> -> vector<8x32xf32>
    %126 = arith.truncf %125 : vector<8x32xf32> to vector<8x32xbf16>
    %cst_35 = arith.constant dense<0.000000e+00> : vector<8x32xf32>
    %127 = tpu.matmul %126, %54, %cst_35 {dimension_numbers = #tpu.dot_dimension_numbers<[1], [0], [0], [1], [0, 0, 1, 1], [], []>} : vector<8x32xbf16>, vector<32x32xbf16>, vector<8x32xf32> -> vector<8x32xf32>
    %128 = vector.broadcast %55 : vector<1x32xf32> to vector<8x32xf32>
    %129 = arith.addf %127, %128 : vector<8x32xf32>
    %130 = arith.addf %129, %43 : vector<8x32xf32>
    %cst_36 = arith.constant dense<0.000000e+00> : vector<8xf32>
    %131 = vector.multi_reduction <add>, %3, %cst_36 [1] : vector<8x32xf32> to vector<8xf32>
    %132 = vector.shape_cast %131 : vector<8xf32> to vector<8x1xf32>
    %cst_37 = arith.constant 3.200000e+01 : f32
    %133 = vector.broadcast %cst_37 : f32 to vector<8x1xf32>
    %134 = arith.divf %132, %133 : vector<8x1xf32>
    %135 = vector.broadcast %134 : vector<8x1xf32> to vector<8x32xf32>
    %136 = arith.subf %3, %135 : vector<8x32xf32>
    %137 = arith.mulf %136, %136 : vector<8x32xf32>
    %cst_38 = arith.constant dense<0.000000e+00> : vector<8xf32>
    %138 = vector.multi_reduction <add>, %137, %cst_38 [1] : vector<8x32xf32> to vector<8xf32>
    %139 = vector.shape_cast %138 : vector<8xf32> to vector<8x1xf32>
    %cst_39 = arith.constant 3.200000e+01 : f32
    %140 = vector.broadcast %cst_39 : f32 to vector<8x1xf32>
    %141 = arith.divf %139, %140 : vector<8x1xf32>
    %cst_40 = arith.constant 9.99999974E-6 : f32
    %142 = vector.broadcast %cst_40 : f32 to vector<8x1xf32>
    %143 = arith.addf %141, %142 : vector<8x1xf32>
    %144 = math.rsqrt %143 : vector<8x1xf32>
    %145 = vector.broadcast %144 : vector<8x1xf32> to vector<8x32xf32>
    %146 = arith.mulf %136, %145 : vector<8x32xf32>
    %147 = vector.broadcast %17 : vector<1x32xf32> to vector<8x32xf32>
    %148 = arith.mulf %146, %147 : vector<8x32xf32>
    %149 = vector.broadcast %19 : vector<1x32xf32> to vector<8x32xf32>
    %150 = arith.addf %148, %149 : vector<8x32xf32>
    %151 = arith.truncf %150 : vector<8x32xf32> to vector<8x32xbf16>
    %cst_41 = arith.constant dense<0.000000e+00> : vector<8xf32>
    %152 = vector.multi_reduction <add>, %5, %cst_41 [1] : vector<8x32xf32> to vector<8xf32>
    %153 = vector.shape_cast %152 : vector<8xf32> to vector<8x1xf32>
    %cst_42 = arith.constant 3.200000e+01 : f32
    %154 = vector.broadcast %cst_42 : f32 to vector<8x1xf32>
    %155 = arith.divf %153, %154 : vector<8x1xf32>
    %156 = vector.broadcast %155 : vector<8x1xf32> to vector<8x32xf32>
    %157 = arith.subf %5, %156 : vector<8x32xf32>
    %158 = arith.mulf %157, %157 : vector<8x32xf32>
    %cst_43 = arith.constant dense<0.000000e+00> : vector<8xf32>
    %159 = vector.multi_reduction <add>, %158, %cst_43 [1] : vector<8x32xf32> to vector<8xf32>
    %160 = vector.shape_cast %159 : vector<8xf32> to vector<8x1xf32>
    %cst_44 = arith.constant 3.200000e+01 : f32
    %161 = vector.broadcast %cst_44 : f32 to vector<8x1xf32>
    %162 = arith.divf %160, %161 : vector<8x1xf32>
    %cst_45 = arith.constant 9.99999974E-6 : f32
    %163 = vector.broadcast %cst_45 : f32 to vector<8x1xf32>
    %164 = arith.addf %162, %163 : vector<8x1xf32>
    %165 = math.rsqrt %164 : vector<8x1xf32>
    %166 = vector.broadcast %165 : vector<8x1xf32> to vector<8x32xf32>
    %167 = arith.mulf %157, %166 : vector<8x32xf32>
    %168 = vector.broadcast %17 : vector<1x32xf32> to vector<8x32xf32>
    %169 = arith.mulf %167, %168 : vector<8x32xf32>
    %170 = vector.broadcast %19 : vector<1x32xf32> to vector<8x32xf32>
    %171 = arith.addf %169, %170 : vector<8x32xf32>
    %172 = arith.truncf %171 : vector<8x32xf32> to vector<8x32xbf16>
    %cst_46 = arith.constant dense<0.000000e+00> : vector<8xf32>
    %173 = vector.multi_reduction <add>, %130, %cst_46 [1] : vector<8x32xf32> to vector<8xf32>
    %174 = vector.shape_cast %173 : vector<8xf32> to vector<8x1xf32>
    %cst_47 = arith.constant 3.200000e+01 : f32
    %175 = vector.broadcast %cst_47 : f32 to vector<8x1xf32>
    %176 = arith.divf %174, %175 : vector<8x1xf32>
    %177 = vector.broadcast %176 : vector<8x1xf32> to vector<8x32xf32>
    %178 = arith.subf %130, %177 : vector<8x32xf32>
    %179 = arith.mulf %178, %178 : vector<8x32xf32>
    %cst_48 = arith.constant dense<0.000000e+00> : vector<8xf32>
    %180 = vector.multi_reduction <add>, %179, %cst_48 [1] : vector<8x32xf32> to vector<8xf32>
    %181 = vector.shape_cast %180 : vector<8xf32> to vector<8x1xf32>
    %cst_49 = arith.constant 3.200000e+01 : f32
    %182 = vector.broadcast %cst_49 : f32 to vector<8x1xf32>
    %183 = arith.divf %181, %182 : vector<8x1xf32>
    %cst_50 = arith.constant 9.99999974E-6 : f32
    %184 = vector.broadcast %cst_50 : f32 to vector<8x1xf32>
    %185 = arith.addf %183, %184 : vector<8x1xf32>
    %186 = math.rsqrt %185 : vector<8x1xf32>
    %187 = vector.broadcast %186 : vector<8x1xf32> to vector<8x32xf32>
    %188 = arith.mulf %178, %187 : vector<8x32xf32>
    %189 = vector.broadcast %13 : vector<1x32xf32> to vector<8x32xf32>
    %190 = arith.mulf %188, %189 : vector<8x32xf32>
    %191 = vector.broadcast %15 : vector<1x32xf32> to vector<8x32xf32>
    %192 = arith.addf %190, %191 : vector<8x32xf32>
    %193 = arith.truncf %192 : vector<8x32xf32> to vector<8x32xbf16>
    %c0_51 = arith.constant 0 : index
    %c0_52 = arith.constant 0 : index
    %c0_53 = arith.constant 0 : index
    %194 = vector.load %arg9[%c0_51, %c0_52, %c0_53] : memref<3x32x32xbf16, #tpu.memory_space<vmem>>, vector<1x32x32xbf16>
    %195 = vector.shape_cast %194 : vector<1x32x32xbf16> to vector<32x32xbf16>
    %cst_54 = arith.constant dense<0.000000e+00> : vector<8x32xf32>
    %196 = tpu.matmul %193, %195, %cst_54 {dimension_numbers = #tpu.dot_dimension_numbers<[1], [0], [0], [1], [0, 0, 1, 1], [], []>} : vector<8x32xbf16>, vector<32x32xbf16>, vector<8x32xf32> -> vector<8x32xf32>
    %c1_55 = arith.constant 1 : index
    %c0_56 = arith.constant 0 : index
    %c0_57 = arith.constant 0 : index
    %197 = vector.load %arg9[%c1_55, %c0_56, %c0_57] : memref<3x32x32xbf16, #tpu.memory_space<vmem>>, vector<1x32x32xbf16>
    %198 = vector.shape_cast %197 : vector<1x32x32xbf16> to vector<32x32xbf16>
    %cst_58 = arith.constant dense<0.000000e+00> : vector<8x32xf32>
    %199 = tpu.matmul %172, %198, %cst_58 {dimension_numbers = #tpu.dot_dimension_numbers<[1], [0], [0], [1], [0, 0, 1, 1], [], []>} : vector<8x32xbf16>, vector<32x32xbf16>, vector<8x32xf32> -> vector<8x32xf32>
    %c2_59 = arith.constant 2 : index
    %c0_60 = arith.constant 0 : index
    %c0_61 = arith.constant 0 : index
    %200 = vector.load %arg9[%c2_59, %c0_60, %c0_61] : memref<3x32x32xbf16, #tpu.memory_space<vmem>>, vector<1x32x32xbf16>
    %201 = vector.shape_cast %200 : vector<1x32x32xbf16> to vector<32x32xbf16>
    %cst_62 = arith.constant dense<0.000000e+00> : vector<8x32xf32>
    %202 = tpu.matmul %151, %201, %cst_62 {dimension_numbers = #tpu.dot_dimension_numbers<[1], [0], [0], [1], [0, 0, 1, 1], [], []>} : vector<8x32xbf16>, vector<32x32xbf16>, vector<8x32xf32> -> vector<8x32xf32>
    %c0_63 = arith.constant 0 : index
    %c0_64 = arith.constant 0 : index
    %203 = vector.load %arg10[%c0_63, %c0_64] : memref<32x32xbf16, #tpu.memory_space<vmem>>, vector<32x32xbf16>
    %c0_65 = arith.constant 0 : index
    %c0_66 = arith.constant 0 : index
    %204 = vector.load %arg11[%c0_65, %c0_66] : memref<1x32xf32, #tpu.memory_space<vmem>>, vector<1x32xf32>
    %205 = arith.truncf %196 : vector<8x32xf32> to vector<8x32xbf16>
    %206 = arith.truncf %199 : vector<8x32xf32> to vector<8x32xbf16>
    %207 = arith.truncf %202 : vector<8x32xf32> to vector<8x32xbf16>
    %208 = vector.extract_strided_slice %205 {offsets = [0, 0], sizes = [8, 8], strides = [1, 1]} : vector<8x32xbf16> to vector<8x8xbf16>
    %209 = vector.shape_cast %208 : vector<8x8xbf16> to vector<1x8x8xbf16>
    %210 = vector.extract_strided_slice %205 {offsets = [0, 8], sizes = [8, 8], strides = [1, 1]} : vector<8x32xbf16> to vector<8x8xbf16>
    %211 = vector.shape_cast %210 : vector<8x8xbf16> to vector<1x8x8xbf16>
    %212 = vector.extract_strided_slice %205 {offsets = [0, 16], sizes = [8, 8], strides = [1, 1]} : vector<8x32xbf16> to vector<8x8xbf16>
    %213 = vector.shape_cast %212 : vector<8x8xbf16> to vector<1x8x8xbf16>
    %214 = vector.extract_strided_slice %205 {offsets = [0, 24], sizes = [8, 8], strides = [1, 1]} : vector<8x32xbf16> to vector<8x8xbf16>
    %215 = vector.shape_cast %214 : vector<8x8xbf16> to vector<1x8x8xbf16>
    %216 = vector.shape_cast %209 : vector<1x8x8xbf16> to vector<1x1x8x8xbf16>
    %217 = vector.shape_cast %211 : vector<1x8x8xbf16> to vector<1x1x8x8xbf16>
    %218 = vector.shape_cast %213 : vector<1x8x8xbf16> to vector<1x1x8x8xbf16>
    %219 = vector.shape_cast %215 : vector<1x8x8xbf16> to vector<1x1x8x8xbf16>
    %220 = tpu.concatenate %216, %217, %218, %219 in 0 : vector<1x1x8x8xbf16>, vector<1x1x8x8xbf16>, vector<1x1x8x8xbf16>, vector<1x1x8x8xbf16> -> vector<4x1x8x8xbf16>
    %221 = vector.shape_cast %220 : vector<4x1x8x8xbf16> to vector<4x8x8xbf16>
    %222 = vector.extract_strided_slice %206 {offsets = [0, 0], sizes = [8, 8], strides = [1, 1]} : vector<8x32xbf16> to vector<8x8xbf16>
    %223 = vector.shape_cast %222 : vector<8x8xbf16> to vector<1x8x8xbf16>
    %224 = vector.extract_strided_slice %206 {offsets = [0, 8], sizes = [8, 8], strides = [1, 1]} : vector<8x32xbf16> to vector<8x8xbf16>
    %225 = vector.shape_cast %224 : vector<8x8xbf16> to vector<1x8x8xbf16>
    %226 = vector.extract_strided_slice %206 {offsets = [0, 16], sizes = [8, 8], strides = [1, 1]} : vector<8x32xbf16> to vector<8x8xbf16>
    %227 = vector.shape_cast %226 : vector<8x8xbf16> to vector<1x8x8xbf16>
    %228 = vector.extract_strided_slice %206 {offsets = [0, 24], sizes = [8, 8], strides = [1, 1]} : vector<8x32xbf16> to vector<8x8xbf16>
    %229 = vector.shape_cast %228 : vector<8x8xbf16> to vector<1x8x8xbf16>
    %230 = vector.shape_cast %223 : vector<1x8x8xbf16> to vector<1x1x8x8xbf16>
    %231 = vector.shape_cast %225 : vector<1x8x8xbf16> to vector<1x1x8x8xbf16>
    %232 = vector.shape_cast %227 : vector<1x8x8xbf16> to vector<1x1x8x8xbf16>
    %233 = vector.shape_cast %229 : vector<1x8x8xbf16> to vector<1x1x8x8xbf16>
    %234 = tpu.concatenate %230, %231, %232, %233 in 0 : vector<1x1x8x8xbf16>, vector<1x1x8x8xbf16>, vector<1x1x8x8xbf16>, vector<1x1x8x8xbf16> -> vector<4x1x8x8xbf16>
    %235 = vector.shape_cast %234 : vector<4x1x8x8xbf16> to vector<4x8x8xbf16>
    %236 = vector.extract_strided_slice %207 {offsets = [0, 0], sizes = [8, 8], strides = [1, 1]} : vector<8x32xbf16> to vector<8x8xbf16>
    %237 = vector.shape_cast %236 : vector<8x8xbf16> to vector<1x8x8xbf16>
    %238 = vector.extract_strided_slice %207 {offsets = [0, 8], sizes = [8, 8], strides = [1, 1]} : vector<8x32xbf16> to vector<8x8xbf16>
    %239 = vector.shape_cast %238 : vector<8x8xbf16> to vector<1x8x8xbf16>
    %240 = vector.extract_strided_slice %207 {offsets = [0, 16], sizes = [8, 8], strides = [1, 1]} : vector<8x32xbf16> to vector<8x8xbf16>
    %241 = vector.shape_cast %240 : vector<8x8xbf16> to vector<1x8x8xbf16>
    %242 = vector.extract_strided_slice %207 {offsets = [0, 24], sizes = [8, 8], strides = [1, 1]} : vector<8x32xbf16> to vector<8x8xbf16>
    %243 = vector.shape_cast %242 : vector<8x8xbf16> to vector<1x8x8xbf16>
    %244 = vector.shape_cast %237 : vector<1x8x8xbf16> to vector<1x1x8x8xbf16>
    %245 = vector.shape_cast %239 : vector<1x8x8xbf16> to vector<1x1x8x8xbf16>
    %246 = vector.shape_cast %241 : vector<1x8x8xbf16> to vector<1x1x8x8xbf16>
    %247 = vector.shape_cast %243 : vector<1x8x8xbf16> to vector<1x1x8x8xbf16>
    %248 = tpu.concatenate %244, %245, %246, %247 in 0 : vector<1x1x8x8xbf16>, vector<1x1x8x8xbf16>, vector<1x1x8x8xbf16>, vector<1x1x8x8xbf16> -> vector<4x1x8x8xbf16>
    %249 = vector.shape_cast %248 : vector<4x1x8x8xbf16> to vector<4x8x8xbf16>
    "tpu.trace_start"() <{level = 10 : i32, message = "bqd,bkd->bqk"}> : () -> ()
    %cst_67 = arith.constant dense<0.000000e+00> : vector<4x8x8xf32>
    %250 = tpu.matmul %221, %235, %cst_67 {dimension_numbers = #tpu.dot_dimension_numbers<[2], [2], [1], [1], [0, 0, 0, 1, 1, 1], [0], [0]>} : vector<4x8x8xbf16>, vector<4x8x8xbf16>, vector<4x8x8xf32> -> vector<4x8x8xf32>
    "tpu.trace_stop"() : () -> ()
    %251 = vector.shape_cast %6 : vector<8x8xf32> to vector<1x8x8xf32>
    %252 = vector.broadcast %251 : vector<1x8x8xf32> to vector<4x8x8xf32>
    %253 = arith.addf %250, %252 : vector<4x8x8xf32>
    %cst_68 = arith.constant dense<0xFF800000> : vector<4x8xf32>
    %254 = vector.multi_reduction <maximumf>, %253, %cst_68 [2] : vector<4x8x8xf32> to vector<4x8xf32>
    %255 = vector.shape_cast %254 : vector<4x8xf32> to vector<4x8x1xf32>
    %256 = vector.broadcast %255 : vector<4x8x1xf32> to vector<4x8x8xf32>
    %257 = arith.subf %253, %256 : vector<4x8x8xf32>
    %258 = math.exp %257 : vector<4x8x8xf32>
    %cst_69 = arith.constant dense<0.000000e+00> : vector<4x8xf32>
    %259 = vector.multi_reduction <add>, %258, %cst_69 [2] : vector<4x8x8xf32> to vector<4x8xf32>
    %260 = vector.shape_cast %259 : vector<4x8xf32> to vector<4x8x1xf32>
    %261 = tpu.reciprocal %260 {approx = true} : vector<4x8x1xf32> -> vector<4x8x1xf32>
    %262 = vector.broadcast %261 : vector<4x8x1xf32> to vector<4x8x8xf32>
    %263 = arith.mulf %258, %262 : vector<4x8x8xf32>
    %264 = arith.truncf %263 : vector<4x8x8xf32> to vector<4x8x8xbf16>
    "tpu.trace_start"() <{level = 10 : i32, message = "bqk,bkd->bqd"}> : () -> ()
    %cst_70 = arith.constant dense<0.000000e+00> : vector<4x8x8xf32>
    %265 = tpu.matmul %264, %249, %cst_70 {dimension_numbers = #tpu.dot_dimension_numbers<[2], [1], [1], [2], [0, 0, 0, 1, 1, 2], [0], [0]>} : vector<4x8x8xbf16>, vector<4x8x8xbf16>, vector<4x8x8xf32> -> vector<4x8x8xf32>
    "tpu.trace_stop"() : () -> ()
    %266 = vector.extract_strided_slice %265 {offsets = [0, 0, 0], sizes = [1, 8, 8], strides = [1, 1, 1]} : vector<4x8x8xf32> to vector<1x8x8xf32>
    %267 = vector.shape_cast %266 : vector<1x8x8xf32> to vector<8x8xf32>
    %268 = vector.extract_strided_slice %265 {offsets = [1, 0, 0], sizes = [1, 8, 8], strides = [1, 1, 1]} : vector<4x8x8xf32> to vector<1x8x8xf32>
    %269 = vector.shape_cast %268 : vector<1x8x8xf32> to vector<8x8xf32>
    %270 = vector.extract_strided_slice %265 {offsets = [2, 0, 0], sizes = [1, 8, 8], strides = [1, 1, 1]} : vector<4x8x8xf32> to vector<1x8x8xf32>
    %271 = vector.shape_cast %270 : vector<1x8x8xf32> to vector<8x8xf32>
    %272 = vector.extract_strided_slice %265 {offsets = [3, 0, 0], sizes = [1, 8, 8], strides = [1, 1, 1]} : vector<4x8x8xf32> to vector<1x8x8xf32>
    %273 = vector.shape_cast %272 : vector<1x8x8xf32> to vector<8x8xf32>
    %274 = tpu.concatenate %267, %269, %271, %273 in 1 : vector<8x8xf32>, vector<8x8xf32>, vector<8x8xf32>, vector<8x8xf32> -> vector<8x32xf32>
    %275 = arith.truncf %274 : vector<8x32xf32> to vector<8x32xbf16>
    %cst_71 = arith.constant dense<0.000000e+00> : vector<8x32xf32>
    %276 = tpu.matmul %275, %203, %cst_71 {dimension_numbers = #tpu.dot_dimension_numbers<[1], [0], [0], [1], [0, 0, 1, 1], [], []>} : vector<8x32xbf16>, vector<32x32xbf16>, vector<8x32xf32> -> vector<8x32xf32>
    %277 = vector.broadcast %204 : vector<1x32xf32> to vector<8x32xf32>
    %278 = arith.addf %276, %277 : vector<8x32xf32>
    %279 = arith.addf %278, %192 : vector<8x32xf32>
    %cst_72 = arith.constant dense<0.000000e+00> : vector<8xf32>
    %280 = vector.multi_reduction <add>, %279, %cst_72 [1] : vector<8x32xf32> to vector<8xf32>
    %281 = vector.shape_cast %280 : vector<8xf32> to vector<8x1xf32>
    %cst_73 = arith.constant 3.200000e+01 : f32
    %282 = vector.broadcast %cst_73 : f32 to vector<8x1xf32>
    %283 = arith.divf %281, %282 : vector<8x1xf32>
    %284 = vector.broadcast %283 : vector<8x1xf32> to vector<8x32xf32>
    %285 = arith.subf %279, %284 : vector<8x32xf32>
    %286 = arith.mulf %285, %285 : vector<8x32xf32>
    %cst_74 = arith.constant dense<0.000000e+00> : vector<8xf32>
    %287 = vector.multi_reduction <add>, %286, %cst_74 [1] : vector<8x32xf32> to vector<8xf32>
    %288 = vector.shape_cast %287 : vector<8xf32> to vector<8x1xf32>
    %cst_75 = arith.constant 3.200000e+01 : f32
    %289 = vector.broadcast %cst_75 : f32 to vector<8x1xf32>
    %290 = arith.divf %288, %289 : vector<8x1xf32>
    %cst_76 = arith.constant 9.99999974E-6 : f32
    %291 = vector.broadcast %cst_76 : f32 to vector<8x1xf32>
    %292 = arith.addf %290, %291 : vector<8x1xf32>
    %293 = math.rsqrt %292 : vector<8x1xf32>
    %294 = vector.broadcast %293 : vector<8x1xf32> to vector<8x32xf32>
    %295 = arith.mulf %285, %294 : vector<8x32xf32>
    %296 = vector.broadcast %21 : vector<1x32xf32> to vector<8x32xf32>
    %297 = arith.mulf %295, %296 : vector<8x32xf32>
    %298 = vector.broadcast %23 : vector<1x32xf32> to vector<8x32xf32>
    %299 = arith.addf %297, %298 : vector<8x32xf32>
    %300 = arith.truncf %299 : vector<8x32xf32> to vector<8x32xbf16>
    %c0_77 = arith.constant 0 : index
    %c0_78 = arith.constant 0 : index
    %301 = vector.load %arg12[%c0_77, %c0_78] : memref<32x128xbf16, #tpu.memory_space<vmem>>, vector<32x128xbf16>
    %cst_79 = arith.constant dense<0.000000e+00> : vector<8x128xf32>
    %302 = tpu.matmul %300, %301, %cst_79 {dimension_numbers = #tpu.dot_dimension_numbers<[1], [0], [0], [1], [0, 0, 1, 1], [], []>} : vector<8x32xbf16>, vector<32x128xbf16>, vector<8x128xf32> -> vector<8x128xf32>
    %c0_80 = arith.constant 0 : index
    %c0_81 = arith.constant 0 : index
    %303 = vector.load %arg13[%c0_80, %c0_81] : memref<1x128xf32, #tpu.memory_space<vmem>>, vector<1x128xf32>
    %304 = vector.broadcast %303 : vector<1x128xf32> to vector<8x128xf32>
    %305 = arith.addf %302, %304 : vector<8x128xf32>
    %cst_82 = arith.constant 5.000000e-01 : f32
    %306 = vector.broadcast %cst_82 : f32 to vector<8x128xf32>
    %307 = arith.mulf %306, %305 : vector<8x128xf32>
    %cst_83 = arith.constant 4.471500e-02 : f32
    %308 = vector.broadcast %cst_83 : f32 to vector<8x128xf32>
    %309 = arith.mulf %308, %305 : vector<8x128xf32>
    %310 = arith.mulf %309, %305 : vector<8x128xf32>
    %311 = arith.mulf %310, %305 : vector<8x128xf32>
    %312 = arith.addf %305, %311 : vector<8x128xf32>
    %cst_84 = arith.constant 0.797884583 : f32
    %313 = vector.broadcast %cst_84 : f32 to vector<8x128xf32>
    %314 = arith.mulf %313, %312 : vector<8x128xf32>
    %315 = math.tanh %314 : vector<8x128xf32>
    %cst_85 = arith.constant 1.000000e+00 : f32
    %316 = vector.broadcast %cst_85 : f32 to vector<8x128xf32>
    %317 = arith.addf %316, %315 : vector<8x128xf32>
    %318 = arith.mulf %307, %317 : vector<8x128xf32>
    %319 = arith.truncf %318 : vector<8x128xf32> to vector<8x128xbf16>
    %c0_86 = arith.constant 0 : index
    %c0_87 = arith.constant 0 : index
    %320 = vector.load %arg14[%c0_86, %c0_87] : memref<128x32xbf16, #tpu.memory_space<vmem>>, vector<128x32xbf16>
    %cst_88 = arith.constant dense<0.000000e+00> : vector<8x32xf32>
    %321 = tpu.matmul %319, %320, %cst_88 {dimension_numbers = #tpu.dot_dimension_numbers<[1], [0], [0], [1], [0, 0, 1, 1], [], []>} : vector<8x128xbf16>, vector<128x32xbf16>, vector<8x32xf32> -> vector<8x32xf32>
    %c0_89 = arith.constant 0 : index
    %c0_90 = arith.constant 0 : index
    %322 = vector.load %arg15[%c0_89, %c0_90] : memref<1x32xf32, #tpu.memory_space<vmem>>, vector<1x32xf32>
    %323 = vector.broadcast %322 : vector<1x32xf32> to vector<8x32xf32>
    %324 = arith.addf %321, %323 : vector<8x32xf32>
    %325 = arith.addf %324, %279 : vector<8x32xf32>
    %326 = vector.shape_cast %325 : vector<8x32xf32> to vector<1x8x32xf32>
    %c0_91 = arith.constant 0 : index
    %c0_92 = arith.constant 0 : index
    %c0_93 = arith.constant 0 : index
    %327 = vector.load %arg16[%c0_91, %c0_92, %c0_93] : memref<1x8x32xf32, #tpu.memory_space<vmem>>, vector<1x8x32xf32>
    tpu.vector_store %arg16[%c0_91, %c0_92, %c0_93], %326 {strides = array<i32>} : memref<1x8x32xf32, #tpu.memory_space<vmem>>, vector<1x8x32xf32>,
    return
  }
  func.func @transform_0(%arg0: i32) -> (i32, i32, i32) {
    %c0_i32 = arith.constant 0 : i32
    %c0_i32_0 = arith.constant 0 : i32
    %c0_i32_1 = arith.constant 0 : i32
    return %arg0, %c0_i32, %c0_i32_0 : i32, i32, i32
  }
  func.func @transform_1(%arg0: i32) -> (i32, i32, i32) {
    %c0_i32 = arith.constant 0 : i32
    %c0_i32_0 = arith.constant 0 : i32
    %c0_i32_1 = arith.constant 0 : i32
    return %arg0, %c0_i32, %c0_i32_0 : i32, i32, i32
  }
  func.func @transform_2(%arg0: i32) -> (i32, i32, i32) {
    %c0_i32 = arith.constant 0 : i32
    %c0_i32_0 = arith.constant 0 : i32
    %c0_i32_1 = arith.constant 0 : i32
    return %arg0, %c0_i32, %c0_i32_0 : i32, i32, i32
  }
  func.func @transform_3(%arg0: i32) -> (i32, i32) {
    %c0_i32 = arith.constant 0 : i32
    %c0_i32_0 = arith.constant 0 : i32
    %c0_i32_1 = arith.constant 0 : i32
    return %c0_i32, %c0_i32_0 : i32, i32
  }
  func.func @transform_4(%arg0: i32) -> (i32, i32, i32) {
    %c0_i32 = arith.constant 0 : i32
    %c0_i32_0 = arith.constant 0 : i32
    %c0_i32_1 = arith.constant 0 : i32
    %c0_i32_2 = arith.constant 0 : i32
    return %c0_i32, %c0_i32_0, %c0_i32_1 : i32, i32, i32
  }
  func.func @transform_5(%arg0: i32) -> (i32, i32, i32) {
    %c0_i32 = arith.constant 0 : i32
    %c0_i32_0 = arith.constant 0 : i32
    %c0_i32_1 = arith.constant 0 : i32
    %c0_i32_2 = arith.constant 0 : i32
    return %c0_i32, %c0_i32_0, %c0_i32_1 : i32, i32, i32
  }
  func.func @transform_6(%arg0: i32) -> (i32, i32) {
    %c0_i32 = arith.constant 0 : i32
    %c0_i32_0 = arith.constant 0 : i32
    %c0_i32_1 = arith.constant 0 : i32
    return %c0_i32, %c0_i32_0 : i32, i32
  }
  func.func @transform_7(%arg0: i32) -> (i32, i32) {
    %c0_i32 = arith.constant 0 : i32
    %c0_i32_0 = arith.constant 0 : i32
    %c0_i32_1 = arith.constant 0 : i32
    return %c0_i32, %c0_i32_0 : i32, i32
  }
  func.func @transform_8(%arg0: i32) -> (i32, i32, i32) {
    %c0_i32 = arith.constant 0 : i32
    %c0_i32_0 = arith.constant 0 : i32
    %c0_i32_1 = arith.constant 0 : i32
    %c0_i32_2 = arith.constant 0 : i32
    return %c0_i32, %c0_i32_0, %c0_i32_1 : i32, i32, i32
  }
  func.func @transform_9(%arg0: i32) -> (i32, i32) {
    %c0_i32 = arith.constant 0 : i32
    %c0_i32_0 = arith.constant 0 : i32
    %c0_i32_1 = arith.constant 0 : i32
    return %c0_i32, %c0_i32_0 : i32, i32
  }
  func.func @transform_10(%arg0: i32) -> (i32, i32) {
    %c0_i32 = arith.constant 0 : i32
    %c0_i32_0 = arith.constant 0 : i32
    %c0_i32_1 = arith.constant 0 : i32
    return %c0_i32, %c0_i32_0 : i32, i32
  }
  func.func @transform_11(%arg0: i32) -> (i32, i32) {
    %c0_i32 = arith.constant 0 : i32
    %c0_i32_0 = arith.constant 0 : i32
    %c0_i32_1 = arith.constant 0 : i32
    return %c0_i32, %c0_i32_0 : i32, i32
  }
  func.func @transform_12(%arg0: i32) -> (i32, i32) {
    %c0_i32 = arith.constant 0 : i32
    %c0_i32_0 = arith.constant 0 : i32
    %c0_i32_1 = arith.constant 0 : i32
    return %c0_i32, %c0_i32_0 : i32, i32
  }
  func.func @transform_13(%arg0: i32) -> (i32, i32) {
    %c0_i32 = arith.constant 0 : i32
    %c0_i32_0 = arith.constant 0 : i32
    %c0_i32_1 = arith.constant 0 : i32
    return %c0_i32, %c0_i32_0 : i32, i32
  }
  func.func @transform_14(%arg0: i32) -> (i32, i32) {
    %c0_i32 = arith.constant 0 : i32
    %c0_i32_0 = arith.constant 0 : i32
    %c0_i32_1 = arith.constant 0 : i32
    return %c0_i32, %c0_i32_0 : i32, i32
  }
  func.func @transform_15(%arg0: i32) -> (i32, i32, i32) {
    %c0_i32 = arith.constant 0 : i32
    %c0_i32_0 = arith.constant 0 : i32
    %c0_i32_1 = arith.constant 0 : i32
    return %arg0, %c0_i32, %c0_i32_0 : i32, i32, i32
  }
}

</mosaic_0001>

<bundles_post_ra>
// kernel: tpu_custom_call.1
= control target key start
LH: loop header
LB: loop body
LE: loop exit
PB: predicated region body
PF: predicated region fallthrough
CT: control target
= control target key end

     0   :  { %s4193_s0 = inlined_call_operand.hbm [shape: f32[2,8,32], index: 0, kind: input, shape index: {}]   ;;  %s4194_s1 = inlined_call_operand.hbm [shape: f32[2,8,32], index: 1, kind: input, shape index: {}]   ;;  %s4195_s2 = inlined_call_operand.hbm [shape: f32[2,8,32], index: 2, kind: input, shape index: {}]   ;;  %s4196_s3 = inlined_call_operand.hbm [shape: f32[8,8], index: 3, kind: input, shape index: {}]   ;;  %s4197_s4 = inlined_call_operand.hbm [shape: f32[4,2,32], index: 4, kind: input, shape index: {}]   ;;  %s4198_s5 = inlined_call_operand.vmem [shape: bf16[3,32,32], index: 5, kind: input, shape index: {}]   ;;  %s4199_s6 = inlined_call_operand.hbm [shape: bf16[32,32], index: 6, kind: input, shape index: {}]   ;;  %s4200_s7 = inlined_call_operand.vmem [shape: f32[1,32], index: 7, kind: input, shape index: {}]   ;;  %s4201_s8 = inlined_call_operand.vmem [shape: bf16[3,32,32], index: 8, kind: input, shape index: {}]   ;;  %s4202_s9 = inlined_call_operand.hbm [shape: bf16[32,32], index: 9, kind: input, shape index: {}]   ;;  %s4203_s10 = inlined_call_operand.vmem [shape: f32[1,32], index: 10, kind: input, shape index: {}]   ;;  %s4204_s11 = inlined_call_operand.hbm [shape: bf16[32,128], index: 11, kind: input, shape index: {}]   ;;  %s4205_s12 = inlined_call_operand.vmem [shape: f32[1,128], index: 12, kind: input, shape index: {}]   ;;  %s4206_s13 = inlined_call_operand.vmem [shape: bf16[128,32], index: 13, kind: input, shape index: {}]   ;;  %s4207_s14 = inlined_call_operand.vmem [shape: f32[1,32], index: 14, kind: input, shape index: {}]   ;;  %s4208_s15 = inlined_call_operand.hbm [shape: f32[2,8,32], index: 15, kind: output, shape index: {}]  }
   0x1   :  { %4241 = sst [smem:[#allocation31_spill]] %s4194_s1 }
   0x2   :  { %4242 = sst [smem:[#allocation32_spill]] %s4196_s3 }
   0x3   :  { %4243 = sst [smem:[#allocation33_spill]] %s4198_s5 }
   0x4   :  { %4244 = sst [smem:[#allocation34_spill]] %s4199_s6 }
   0x5   :  { %4245 = sst [smem:[#allocation35_spill]] %s4200_s7 }
   0x6   :  { %4246 = sst [smem:[#allocation36_spill]] %s4201_s8 }
   0x7   :  { %4247 = sst [smem:[#allocation37_spill]] %s4203_s10 }
   0x8   :  { %4248 = sst [smem:[#allocation38_spill]] %s4205_s12 }
   0x9   :  { %4249 = sst [smem:[#allocation39_spill]] %s4206_s13 }
   0xa   :  { %4250 = sst [smem:[#allocation40_spill]] %s4207_s14 }
   0xb   :  { %4251 = sst [smem:[#allocation41_spill]] %s4208_s15 }
   0xc   :  { %20 = vsyncpa [#allocation3], 0 }
   0xd   :  { %22 = vsyncpa [#allocation3 + $0x1], 0 }
   0xe   :  { %23 = vsyncpa [#allocation6], 0 }
   0xf   :  { %25 = vsyncpa [#allocation6 + $0x1], 0 }
  0x10   :  { %26 = vsyncpa [#allocation9], 0 }
  0x11   :  { %27 = vsyncpa [#allocation12], 0 }
  0x12   :  { %28 = vsyncpa [#allocation15], 0 }
  0x13   :  { %29 = vsyncpa [#allocation4], 0 }
  0x14   :  { %31 = vsyncpa [#allocation4 + $0x1], 0  ;;  %s3500_s18 = smov 0   ;;  %s3502_s19 = smov 0  }
  0x15   :  { %s3504_s20 = smov 0   ;;  %s3506_s21 = smov 0  }
  0x16 LB: > { %4252 = sst [smem:[#allocation23_spill]] %s3385_s18  ;;  %s3399_s22 = smov [#allocation8]   ;;  %s3397_s21 = sphi %s3506_s21, %s4305_s21   ;;  %s3393_s20 = sphi %s3504_s20, %s4309_s20   ;;  %s3389_s19 = sphi %s3502_s19, %s4308_s19   ;;  %s3385_s18 = sphi %s3500_s18, %s4307_s18  }
  0x17   : > { %4253 = sst [smem:[#allocation24_spill]] %s3397_s21  ;;  %s411_s23 = sshll.u32 %s3399_s22, 4  ;;  %s412_s23 = int_to_ptr.vmem [resolvable:$true] %s411_s23 }
  0x18   : > { %s3521_s24 = sadd.s32 4294967295, %s3397_s21   ;;  %p2542_p0 = scmp.ge.s32.totalorder %s3397_s21, 1 }
  0x19   : > { %4254 = sst [smem:[#allocation25_spill]] %s3521_s24  ;;  %p4210_p1 = scmp.eq.s32.totalorder %s3521_s24, 0 }
  0x1a   : > { %p398_p2 = scmp.lt.s32.totalorder %s3397_s21, 3  ;;  %s3400_s26 = smov [#allocation11]  }
  0x1b   : > { %s437_s27 = sshll.u32 %s3400_s26, 4  ;;  %s4257_s3 = sld [smem:[#allocation32_spill]]  ;;  %s3533_s27 = int_to_ptr.vmem [resolvable:$true] %s437_s27 }
  0x1c   : > { %p3526_p3 = pnand %p2542_p0, %p398_p2 }
  0x1e   : > { %s4255_s25 = scalar_select %p3526_p3, 1, 0 }
  0x1f   : > { %p2924_p5 = pneg %p3526_p3 }
  0x21   : > { %p3537_p6 = pnand %p2924_p5, %p4210_p1  ;;  %s3085_s16 = scalar_lea.hbm %s4257_s3, 128 }
  0x22   : > { %p3086_p7 = scmp.ne.s32.totalorder %s4257_s3, %s3085_s16  ;;  %p3092_p11 = scmp.lt.u32.totalorder %s3085_s16, %s4257_s3 }
  0x23   : > { %s4256_s28 = scalar_select %p3537_p6, 1, 0 }
  0x24   : > { %p3549_p8 = pneg %p3537_p6 }
  0x26   : > { %s4258_s15 = scalar_select %p3549_p8, 1, 0 }
  0x27   : > { %p3088_p9 = pnand %p3549_p8, %p3086_p7 }
  0x29   : > { %p3089_p10 = pneg %p3088_p9 }
  0x2b   : > { %p3094_p12 = pnand %p3092_p11, %p3089_p10 }
  0x2d   : > { %3097 = shalt.err (!%p3094_p12)
}
  0x2e   : > { %s3098_s29 = scalar_lea.vmem %s412_s23, 128  ;;  %p3106_p5 = scmp.lt.s32.totalorder %s412_s23, %s412_s23 }
  0x2f   : > { %p3099_p13 = scmp.ne.s32.totalorder %s412_s23, %s3098_s29  ;;  %p3107_p4 = scmp.lt.s32.totalorder %s3098_s29, %s3098_s29 }
  0x31   : > { %p3101_p0 = pnand %p3099_p13, %p3549_p8  ;;  %p3108_p1 = por %p3107_p4, %p3106_p5 }
  0x33   : > { %p3102_p2 = pneg %p3101_p0 }
  0x35   : > { %p3109_p3 = pnand %p3108_p1, %p3102_p2 }
  0x37   : > { %3112 = shalt.err (!%p3109_p3)
}
  0x38   : > { %2927 = dma.hbm_to_vmem [thread:$0]  (!%p3537_p6), %s4257_s3, 128, %s412_s23, [#allocation9]  }
  0x39   : > { %s4259_s6 = sld [smem:[#allocation34_spill]] }
  0x3f   : > { %s3113_s22 = scalar_lea.hbm %s4259_s6, 256 }
  0x40   : > { %p3114_p7 = scmp.ne.s32.totalorder %s4259_s6, %s3113_s22  ;;  %p3120_p1 = scmp.lt.u32.totalorder %s3113_s22, %s4259_s6 }
  0x42   : > { %p3116_p9 = pnand %p3114_p7, %p3549_p8 }
  0x44   : > { %p3117_p4 = pneg %p3116_p9 }
  0x46   : > { %p3122_p3 = pnand %p3120_p1, %p3117_p4 }
  0x48   : > { %3125 = shalt.err (!%p3122_p3)
}
  0x49   : > { %s3126_s23 = scalar_lea.vmem %s3533_s27, 256  ;;  %p3134_p13 = scmp.lt.s32.totalorder %s3533_s27, %s3533_s27 }
  0x4a   : > { %p3127_p10 = scmp.ne.s32.totalorder %s3533_s27, %s3126_s23  ;;  %p3135_p0 = scmp.lt.s32.totalorder %s3126_s23, %s3126_s23 }
  0x4c   : > { %p3129_p11 = pnand %p3127_p10, %p3549_p8  ;;  %p3136_p2 = por %p3135_p0, %p3134_p13 }
  0x4e   : > { %p3130_p12 = pneg %p3129_p11 }
  0x50   : > { %p3137_p5 = pnand %p3136_p2, %p3130_p12 }
  0x52   : > { %3140 = shalt.err (!%p3137_p5)
}
  0x53   : > { %s4213_s12 = smov 64   ;;  %s4215_s13 = smov 4  }
  0x54   : > { %2933 = dma.hbm_to_vmem [thread:$0]  (!%p3537_p6), %s4259_s6, 256, %s3533_s27, [#allocation12], %s4213_s12, %s4213_s12, %s4215_s13  }
  0x55   : > { %s2541_s14 = sadd.s32 4294967294, %s3397_s21   ;;  %s3593_s16 = sadd.s32 1, %s3397_s21  }
  0x56   : > { %4260 = sst [smem:[#allocation26_spill]] %s3593_s16  ;;  %s41_s22 = ssub.s32 %s3397_s21, %s3593_s16 }
  0x57   : > { %s44_s26 = sadd.s32 1, %s3393_s20  ;;  %p42_p7 = scmp.eq.s32.totalorder %s41_s22, 0 }
  0x58   : > { %p51_p9 = scmp.ne.s32.totalorder %s3393_s20, %s3389_s19  ;;  %p52_p4 = scmp.eq.s32.totalorder %s3397_s21, 0 }
  0x59   : > { %p57_p1 = scmp.ne.s32.totalorder %s3389_s19, %s3385_s18  ;;  %p4262_p10 = scmp.eq.s32.totalorder %s3521_s24, 0 }
  0x5a   : > { %s3604_s29 = scalar_select %p42_p7, %s3393_s20, %s44_s26  }
  0x5b   : > { %p53_p3 = por %p52_p4, %p51_p9  ;;  %p3608_p11 = por %p4262_p10, %p57_p1 }
  0x5c   : > { %4261 = sst [smem:[#allocation27_spill]] %s3604_s29  ;;  %p385_p12 = scmp.eq.s32.totalorder %s3521_s24, 1 }
  0x5d   : > { %s4263_s23 = scalar_select %p3608_p11, 1, 0 }
  0x5e   : > { %p391_p13 = scmp.eq.s32.totalorder %s2541_s14, 1  ;;  %p2959_p0 = scmp.lt.s32.totalorder %s3397_s21, 2 }
  0x5f   : > { %4264 = sst [smem:[#allocation28_spill]] %s4263_s23  ;;  %s4217_s27 = sand.u32 1, %s3393_s20  }
  0x60   : > { %p3615_p2 = por %p385_p12, %p51_p9  ;;  %p3619_p5 = por %p391_p13, %p57_p1 }
  0x61   : > { %s3625_s22 = sshll.u32 %s4217_s27, 3  ;;  %s3628_s26 = sshll.u32 %s3397_s21, 7 }
  0x62   : > { %s4265_s30 = scalar_select %p3615_p2, 1, 0 }
  0x63   : > { %s4267_s17 = scalar_select %p3619_p5, 1, 0 }
  0x64   : > { %4266 = sst [smem:[#allocation29_spill]] %s4265_s30  ;;  %p3630_p7 = pnand %p2959_p0, %p53_p3 }
  0x65   : > { %4268 = sst [smem:[#allocation30_spill]] %s4267_s17  ;;  %s513_s14 = sand.u32 1, %s3397_s21  }
  0x66   : > { %s4269_s12 = scalar_select %p3630_p7, 1, 0 }
  0x67   : > { %s4270_s1 = sld [smem:[#allocation31_spill]]  ;;  %s517_s27 = scalar_lea.vmem [#allocation5], %s3625_s22 }
  0x68   : > { %s524_s29 = sshll.u32 %s517_s27, 4  ;;  %s3403_s16 = smov [#allocation10]   ;;  %s3642_s29 = int_to_ptr.vmem [resolvable:$true] %s524_s29 }
  0x69   : > { %s3644_s17 = sshll.u32 %s3403_s16, 4  ;;  %s3646_s18 = scalar_lea.sflag [#allocation6], %s513_s14  ;;  %s422_s17 = int_to_ptr.vmem [resolvable:$true] %s3644_s17 }
  0x6a   : > { %p3652_p4 = pneg %p3630_p7 }
  0x6c   : > { %s4271_s3 = scalar_select %p3652_p4, 1, 0 }
  0x6d   : > { %s3639_s6 = scalar_lea.hbm %s4270_s1, %s3628_s26  ;;  %s3146_s21 = scalar_lea.hbm %s4270_s1, 256 }
  0x6e   : > { %s3141_s30 = scalar_lea.hbm %s3639_s6, 128  ;;  %p3147_p10 = scmp.lt.u32.totalorder %s3639_s6, %s4270_s1 }
  0x6f   : > { %p3142_p9 = scmp.ne.s32.totalorder %s3639_s6, %s3141_s30  ;;  %p3148_p12 = scmp.lt.u32.totalorder %s3146_s21, %s3141_s30 }
  0x70   : > { %p3150_p0 = scmp.lt.u32.totalorder %s3141_s30, %s3639_s6 }
  0x71   : > { %p3144_p1 = pnand %p3652_p4, %p3142_p9  ;;  %p3149_p13 = por %p3148_p12, %p3147_p10 }
  0x73   : > { %p3145_p3 = pneg %p3144_p1  ;;  %p3151_p5 = por %p3150_p0, %p3149_p13 }
  0x75   : > { %p3152_p2 = pnand %p3151_p5, %p3145_p3 }
  0x77   : > { %3155 = shalt.err (!%p3152_p2)
}
  0x78   : > { %s3156_s14 = scalar_lea.vmem %s3642_s29, 128  ;;  %s3404_s13 = smov [#allocation5]  }
  0x79   : > { %p3157_p9 = scmp.ne.s32.totalorder %s3642_s29, %s3156_s14  ;;  %s3161_s27 = sshll.u32 %s3404_s13, 4  ;;  %s3162_s27 = int_to_ptr.vmem [resolvable:$false] %s3161_s27 }
  0x7a   : > { %s3163_s10 = scalar_lea.vmem %s3162_s27, 256  ;;  %p3164_p6 = scmp.lt.s32.totalorder %s3642_s29, %s3162_s27 }
  0x7b   : > { %p3159_p1 = pnand %p3157_p9, %p3652_p4  ;;  %p3165_p8 = scmp.lt.s32.totalorder %s3163_s10, %s3156_s14 }
  0x7d   : > { %p3160_p11 = pneg %p3159_p1  ;;  %p3166_p10 = por %p3165_p8, %p3164_p6 }
  0x7f   : > { %p3167_p12 = pnand %p3166_p10, %p3160_p11 }
  0x81   : > { %3170 = shalt.err (!%p3167_p12)
}
  0x82   : > { %2946 = dma.hbm_to_vmem [thread:$0]  (!%p3630_p7), %s3639_s6, 128, %s3642_s29, %s3646_s18  }
  0x83   : > { %s3171_s16 = scalar_lea.hbm %s4197_s4, 128  ;;  %p4272_p6 = scmp.ne.s32.totalorder %s4258_s15, 0 }
  0x84   : > { %p3172_p2 = scmp.ne.s32.totalorder %s4197_s4, %s3171_s16  ;;  %p3178_p5 = scmp.lt.u32.totalorder %s3171_s16, %s4197_s4 }
  0x86   : > { %p3174_p8 = pnand %p3172_p2, %p4272_p6 }
  0x88   : > { %p3175_p11 = pneg %p3174_p8 }
  0x8a   : > { %p3180_p3 = pnand %p3178_p5, %p3175_p11 }
  0x8c   : > { %3183 = shalt.err (!%p3180_p3)
}
  0x8d   : > { %s3184_s10 = scalar_lea.vmem %s422_s17, 128  ;;  %p3192_p1 = scmp.lt.s32.totalorder %s422_s17, %s422_s17 }
  0x8e   : > { %p3185_p13 = scmp.ne.s32.totalorder %s422_s17, %s3184_s10  ;;  %p3193_p10 = scmp.lt.s32.totalorder %s3184_s10, %s3184_s10 }
  0x90   : > { %p3187_p0 = pnand %p3185_p13, %p4272_p6  ;;  %p3194_p12 = por %p3193_p10, %p3192_p1 }
  0x92   : > { %p3188_p9 = pneg %p3187_p0 }
  0x94   : > { %p3195_p7 = pnand %p3194_p12, %p3188_p9 }
  0x96   : > { %3198 = shalt.err (!%p3195_p7)
}
  0x97   : > { %s3405_s1 = smov 32   ;;  %s3406_s6 = smov 2  }
  0x98   : > { %p4273_p2 = scmp.ne.s32.totalorder %s4256_s28, 0  ;;  %s3407_s30 = smov [#allocation13]  }
  0x99   : > { %s456_s16 = sshll.u32 %s3407_s30, 4  ;;  %s3408_s13 = smov [#allocation14]   ;;  %s457_s16 = int_to_ptr.vmem [resolvable:$true] %s456_s16 }
  0x9a   : > { %2930 = dma.hbm_to_vmem [thread:$0]  (!%p4273_p2), %s4197_s4, 128, %s422_s17, [#allocation9], %s3405_s1, %s3405_s1, %s3406_s6  }
  0x9b   : > { %s472_s14 = sshll.u32 %s3408_s13, 4  ;;  %s3199_s10 = scalar_lea.hbm %s4202_s9, 256  ;;  %s473_s14 = int_to_ptr.vmem [resolvable:$true] %s472_s14 }
  0x9c   : > { %p3200_p7 = scmp.ne.s32.totalorder %s4202_s9, %s3199_s10  ;;  %p3206_p5 = scmp.lt.u32.totalorder %s3199_s10, %s4202_s9 }
  0x9e   : > { %p3202_p8 = pnand %p3200_p7, %p4272_p6 }
  0xa0   : > { %p3203_p11 = pneg %p3202_p8 }
  0xa2   : > { %p3208_p3 = pnand %p3206_p5, %p3203_p11 }
  0xa4   : > { %3211 = shalt.err (!%p3208_p3)
}
  0xa5   : > { %s3212_s17 = scalar_lea.vmem %s457_s16, 256  ;;  %p3220_p1 = scmp.lt.s32.totalorder %s457_s16, %s457_s16 }
  0xa6   : > { %p3213_p13 = scmp.ne.s32.totalorder %s457_s16, %s3212_s17  ;;  %p3221_p10 = scmp.lt.s32.totalorder %s3212_s17, %s3212_s17 }
  0xa8   : > { %p3215_p0 = pnand %p3213_p13, %p4272_p6  ;;  %p3222_p12 = por %p3221_p10, %p3220_p1 }
  0xaa   : > { %p3216_p9 = pneg %p3215_p0 }
  0xac   : > { %p3223_p4 = pnand %p3222_p12, %p3216_p9 }
  0xae   : > { %3226 = shalt.err (!%p3223_p4)
}
  0xaf   : > { %s4274_s5 = smov 4   ;;  %s4275_s7 = smov 64  }
  0xb0   : > { %2936 = dma.hbm_to_vmem [thread:$0]  (!%p4273_p2), %s4202_s9, 256, %s457_s16, [#allocation12], %s4275_s7, %s4275_s7, %s4274_s5  }
  0xb1   : > { %s3227_s6 = scalar_lea.hbm %s4204_s11, 256 }
  0xb2   : > { %p3228_p7 = scmp.ne.s32.totalorder %s4204_s11, %s3227_s6  ;;  %p3234_p11 = scmp.lt.u32.totalorder %s3227_s6, %s4204_s11 }
  0xb4   : > { %p3230_p4 = pnand %p3228_p7, %p4272_p6 }
  0xb6   : > { %p3231_p8 = pneg %p3230_p4 }
  0xb8   : > { %p3236_p5 = pnand %p3234_p11, %p3231_p8 }
  0xba   : > { %3239 = shalt.err (!%p3236_p5)
}
  0xbb   : > { %s3240_s27 = scalar_lea.vmem %s473_s14, 256  ;;  %p3248_p9 = scmp.lt.s32.totalorder %s473_s14, %s473_s14 }
  0xbc   : > { %p3241_p3 = scmp.ne.s32.totalorder %s473_s14, %s3240_s27  ;;  %p3249_p1 = scmp.lt.s32.totalorder %s3240_s27, %s3240_s27 }
  0xbe   : > { %p3243_p13 = pnand %p3241_p3, %p4272_p6  ;;  %p3250_p10 = por %p3249_p1, %p3248_p9 }
  0xc0   : > { %p3244_p0 = pneg %p3243_p13 }
  0xc2   : > { %p3251_p12 = pnand %p3250_p10, %p3244_p0 }
  0xc4   : > { %3254 = shalt.err (!%p3251_p12)
}
  0xc5   : > { %2939 = dma.hbm_to_vmem [thread:$0]  (!%p4273_p2), %s4204_s11, 256, %s473_s14, [#allocation15], %s4275_s7, %s4275_s7, %s4274_s5  }
  0xc6   : > { %s3741_s8 = scalar_lea.hbm %s4193_s0, %s3628_s26  ;;  %s499_s28 = scalar_lea.vmem [#allocation2], %s3625_s22 }
  0xc7   : > { %s506_s24 = sshll.u32 %s499_s28, 4  ;;  %s3750_s6 = scalar_lea.hbm %s4195_s2, %s3628_s26  ;;  %s3744_s24 = int_to_ptr.vmem [resolvable:$true] %s506_s24 }
  0xc8   : > { %s4276_s29 = sand.u32 1, %s3393_s20   ;;  %s3255_s5 = scalar_lea.hbm %s3741_s8, 128 }
  0xc9   : > { %s496_s14 = scalar_lea.sflag [#allocation3], %s4276_s29  ;;  %p3256_p6 = scmp.ne.s32.totalorder %s3741_s8, %s3255_s5 }
  0xca   : > { %p4277_p2 = scmp.ne.s32.totalorder %s4271_s3, 0  ;;  %s3260_s30 = scalar_lea.hbm %s4193_s0, 256 }
  0xcb   : > { %p3261_p8 = scmp.lt.u32.totalorder %s3741_s8, %s4193_s0  ;;  %p3262_p11 = scmp.lt.u32.totalorder %s3260_s30, %s3255_s5 }
  0xcc   : > { %p3258_p7 = pnand %p3256_p6, %p4277_p2  ;;  %p3264_p3 = scmp.lt.u32.totalorder %s3255_s5, %s3741_s8 }
  0xcd   : > { %p3263_p5 = por %p3262_p11, %p3261_p8 }
  0xce   : > { %p3259_p4 = pneg %p3258_p7 }
  0xcf   : > { %p3265_p13 = por %p3264_p3, %p3263_p5 }
  0xd1   : > { %p3266_p0 = pnand %p3265_p13, %p3259_p4 }
  0xd3   : > { %3269 = shalt.err (!%p3266_p0)
}
  0xd4   : > { %s3270_s26 = scalar_lea.vmem %s3744_s24, 128  ;;  %s3409_s16 = smov [#allocation2]  }
  0xd5   : > { %p3271_p9 = scmp.ne.s32.totalorder %s3744_s24, %s3270_s26  ;;  %s3275_s10 = sshll.u32 %s3409_s16, 4  ;;  %s3276_s10 = int_to_ptr.vmem [resolvable:$false] %s3275_s10 }
  0xd6   : > { %s3277_s15 = scalar_lea.vmem %s3276_s10, 256  ;;  %p3278_p12 = scmp.lt.s32.totalorder %s3744_s24, %s3276_s10 }
  0xd7   : > { %p3273_p1 = pnand %p3271_p9, %p4277_p2  ;;  %p3279_p6 = scmp.lt.s32.totalorder %s3277_s15, %s3270_s26 }
  0xd9   : > { %p3274_p10 = pneg %p3273_p1  ;;  %p3280_p7 = por %p3279_p6, %p3278_p12 }
  0xdb   : > { %p3281_p8 = pnand %p3280_p7, %p3274_p10 }
  0xdd   : > { %3284 = shalt.err (!%p3281_p8)
}
  0xde   : > { %p4278_p4 = scmp.ne.s32.totalorder %s4269_s12, 0  ;;  %s535_s17 = scalar_lea.vmem [#allocation7], %s3625_s22 }
  0xdf   : > { %s542_s28 = sshll.u32 %s535_s17, 4  ;;  %s3285_s23 = scalar_lea.hbm %s3750_s6, 128  ;;  %s543_s28 = int_to_ptr.vmem [resolvable:$true] %s542_s28 }
  0xe0   : > { %2943 = dma.hbm_to_vmem [thread:$0]  (!%p4278_p4), %s3741_s8, 128, %s3744_s24, %s496_s14  }
  0xe1   : > { %p3286_p11 = scmp.ne.s32.totalorder %s3750_s6, %s3285_s23  ;;  %s3290_s5 = scalar_lea.hbm %s4195_s2, 256 }
  0xe2   : > { %p3291_p13 = scmp.lt.u32.totalorder %s3750_s6, %s4195_s2  ;;  %p3292_p0 = scmp.lt.u32.totalorder %s3290_s5, %s3285_s23 }
  0xe3   : > { %p3288_p5 = pnand %p3286_p11, %p4277_p2  ;;  %p3294_p1 = scmp.lt.u32.totalorder %s3285_s23, %s3750_s6 }
  0xe4   : > { %p3293_p9 = por %p3292_p0, %p3291_p13 }
  0xe5   : > { %p3289_p3 = pneg %p3288_p5 }
  0xe6   : > { %p3295_p10 = por %p3294_p1, %p3293_p9 }
  0xe8   : > { %p3296_p12 = pnand %p3295_p10, %p3289_p3 }
  0xea   : > { %3299 = shalt.err (!%p3296_p12)
}
  0xeb   : > { %s3300_s22 = scalar_lea.vmem %s543_s28, 128  ;;  %s3410_s8 = smov [#allocation7]  }
  0xec   : > { %p3301_p6 = scmp.ne.s32.totalorder %s543_s28, %s3300_s22  ;;  %s3305_s24 = sshll.u32 %s3410_s8, 4  ;;  %s3306_s24 = int_to_ptr.vmem [resolvable:$false] %s3305_s24 }
  0xed   : > { %s3307_s14 = scalar_lea.vmem %s3306_s24, 256  ;;  %p3308_p11 = scmp.lt.s32.totalorder %s543_s28, %s3306_s24 }
  0xee   : > { %p3303_p7 = pnand %p3301_p6, %p4277_p2  ;;  %p3309_p5 = scmp.lt.s32.totalorder %s3307_s14, %s3300_s22 }
  0xf0   : > { %p3304_p8 = pneg %p3303_p7  ;;  %p3310_p4 = por %p3309_p5, %p3308_p11 }
  0xf2   : > { %p3311_p0 = pnand %p3310_p4, %p3304_p8 }
  0xf4   : > { %3314 = shalt.err (!%p3311_p0)
}
  0xf5   : > { %p4279_p13 = scmp.ne.s32.totalorder %s4269_s12, 0  ;;  %p4280_p3 = scmp.ne.s32.totalorder %s4255_s25, 0 }
  0xf6   : > { %s4281_s3 = sld [smem:[#allocation28_spill]] (!%p4280_p3)  ;;  %s3797_s30 = sand.u32 (!%p4280_p3), 1, %s3389_s19  }
  0xf7   : > { %2949 = dma.hbm_to_vmem [thread:$0]  (!%p4279_p13), %s3750_s6, 128, %s543_s28, %s3646_s18  }
  0xf8   : > { %551 = sbr.rel (%p4280_p3) target bundleno = 4623 (0x120f), region = 80  ;;  %s3800_s13 = sshll.u32 (!%p4280_p3), %s3797_s30, 3 }
  0xf9   : > { %s554_s27 = scalar_lea.sflag (!%p4280_p3), [#allocation3], %s3797_s30  ;;  %s557_s26 = scalar_lea.vmem (!%p4280_p3), [#allocation2], %s3800_s13 }
  0xfc   : > { %p4282_p2 = scmp.ne.s32.totalorder (!%p4280_p3), %s4281_s3, 0 }
  0xff   : > { %3360 = dma.done.wait (%p4282_p2), %s554_s27, 128  }
 0x100   : > { %3362 = vsyncadd (%p4282_p2), %s554_s27, 4294967168  ;;  %s4283_s18 = sld [smem:[#allocation25_spill]]  ;;  %s566_s6 = scalar_lea.vmem [#allocation5], %s3800_s13 }
 0x106   : > { %s562_s25 = sand.u32 1, %s4283_s18  }
 0x107   : > { %s563_s12 = scalar_lea.sflag [#allocation6], %s562_s25 }
 0x108   : > { %3364 = dma.done.wait (%p4282_p2), %s563_s12, 256  }
 0x109   : > { %3366 = vsyncadd (%p4282_p2), %s563_s12, 4294967040  ;;  %s575_s16 = scalar_lea.vmem [#allocation7], %s3800_s13  ;;  %p4284_p4 = scmp.eq.s32.totalorder %s4283_s18, 0 }
 0x10b   : > { %3368 = dma.done.wait (%p4284_p4), [#allocation9], 256   ;;  %p4285_p9 = pmov %p4284_p4 }
 0x10c   : > { %p4286_p1 = pmov %p4284_p4 }
 0x10d   : > { %3370 = vsyncadd (%p4285_p9), [#allocation9], 4294967040 }
 0x10e   : > { %3372 = dma.done.wait (%p4286_p1), [#allocation12], 512   ;;  %p4287_p10 = pmov %p4286_p1 }
 0x10f   : > { %p4288_p12 = pmov %p4286_p1 }
 0x110   : > { %3374 = vsyncadd (%p4287_p10), [#allocation12], 4294966784 }
 0x111   : > { %3376 = dma.done.wait (%p4288_p12), [#allocation15], 256   ;;  %p4289_p6 = pmov %p4286_p1 }
 0x112   : > { %vm661_vm0 = vcmask 261120   ;;  %v653_v0 = vld [vmem:[%s557_s26] sm:$0xff]  ;;  %s4290_s17 = sld [smem:[#allocation33_spill]]  ;;  %v3411_v8 = vmov 0.0   ;;  %vm3412_vm1 = vmmov 0   ;;  %v676_v12 = vlaneseq  ;;  %s3413_s14 = smov 120  }
 0x113   : > { %3378 = vsyncadd (%p4289_p6), [#allocation15], 4294967040  ;;  %v662_v1 = vsel %vm661_vm0, %v653_v0, 0.0  ;;  %2708 = vmatprep.subr.bf16.mxu0 %v3411_v8  ;;  %2732 = vmatprep.subr.bf16.mxu1 %v3411_v8  ;;  %v657_v16 = vld [vmem:[#allocation10] sm:$0x3]  ;;  %vm889_vm2 = vcmask 64512  }
 0x114   : > { %663 = vadd.xlane.f32.xlu0 %v662_v1  ;;  %2712 = vmatprep.mubr.msk.bf16.mxu0 %vm3412_vm1, %v3411_v8  ;;  %v677_v14 = vshrl.u32 %v676_v12, 7  ;;  %s3414_s3 = smov 112   ;;  %s3415_s27 = smov 104   ;;  %vm1125_vm3 = vcmask 1043456   ;;  %v3909_v55 = vld [vmem:[#allocation8] sm:$0xff]  ;;  %vm1320_vm4 = vcmask 130048  }
 0x115   : > { %2734 = vmatprep.mubr.msk.bf16.mxu1 %vm3412_vm1, %v3411_v8  ;;  %s3416_s26 = smov 8   ;;  %s3417_s25 = smov 16   ;;  %vm1322_vm5 = vcmask 195584  }
 0x116   : > { %v3843_v15 = vsub.s32 0, %v677_v14  ;;  %v3845_v17 = vsub.s32 1, %v677_v14  ;;  %s3418_s12 = smov 24   ;;  %s4291_s15 = sld [smem:[#allocation35_spill]] }
 0x117   : > { %s4292_s1 = sld [smem:[#allocation36_spill]]  ;;  %s4296_s28 = sld [smem:[#allocation40_spill]] }
 0x118   : > { %v3015_v7 = vld [vmem:[%s4290_s17] sm:$0xff]   ;;  %v3016_v9 = vld [vmem:[%s4290_s17 + $0x8] sm:$0xff]   ;;  %v679_v18 = vrot.slane %v657_v16, %v3843_v15  ;;  %v684_v21 = vrot.slane %v657_v16, %v3845_v17  ;;  %v3017_v24 = vld [vmem:[%s4290_s17 + $0x10] sm:$0xff]   ;;  %s4297_s23 = sld [smem:[#allocation29_spill]]  ;;  %s2637_s29 = sshll.u32 %s4283_s18, 7 }
 0x119   : > { %2709 = vmatpush3.bf16.msra.mxu0 %v3015_v7  ;;  %v3018_v26 = vld [vmem:[%s4290_s17 + $0x18] sm:$0xff]   ;;  %v3019_v27 = vld [vmem:[%s4290_s17 + $0x20] sm:$0xff]   ;;  %v3020_v28 = vld [vmem:[%s4290_s17 + $0x28] sm:$0xff]   ;;  %s651_s5 = scalar_lea.vmem [#allocation16], %s3800_s13  ;;  %s4298_s22 = sld [smem:[#allocation41_spill]] }
 0x11a   : > { %2710 = vmatprep.subr.bf16.mxu0 %v3411_v8  ;;  %s2367_s13 = scalar_lea.sflag [#allocation4], %s3797_s30  ;;  %s3419_s24 = smov [#allocation16]  }
 0x11d   : > { %2711 = vmatpush3.bf16.msra.mxu0 %v3016_v9 }
 0x11e   : > { %2716 = vmatprep.subr.bf16.mxu0 %v3411_v8  ;;  %p4299_p8 = scmp.ne.s32.totalorder %s4297_s23, 0 }
 0x11f   : > { %s4148_s8 = scalar_lea.hbm %s4298_s22, %s2637_s29 }
 0x1a1   : > { %v664_v2 = vpop.xlane.xlu0 %663 }
 0x1a2   : > { %v666_v3 = vmul.f32 0.03125, %v664_v2 }
 0x1a4   : > { %v667_v4 = vsub.f32 %v653_v0, %v666_v3 }
 0x1a6   : > { %v668_v5 = vmul.f32 %v667_v4, %v667_v4 }
 0x1a8   : > { %v669_v6 = vsel %vm661_vm0, %v668_v5, 0.0 }
 0x1a9   : > { %670 = vadd.xlane.f32.xlu0 %v669_v6 }
 0x236   : > { %v671_v10 = vpop.xlane.xlu0 %670 }
 0x237   : > { %v672_v11 = vmul.f32 0.03125, %v671_v10 }
 0x239   : > { %v673_v13 = vadd.f32 1e-05, %v672_v11 }
 0x23b   : > { %3041 = vrsqrt.f32 %v673_v13 }
 0x245   : > { %v3042_v19 = vpop.eup %3041 }
 0x246   : > { %v675_v20 = vmul.f32 %v3042_v19, %v667_v4 }
 0x248   : > { %v680_v22 = vmul.f32 %v679_v18, %v675_v20 }
 0x24a   : > { %v3849_v23 = vadd.f32 %v684_v21, %v680_v22 }
 0x24c   : > { %v686_v25 = vpack.c.bf16 %v3849_v23, %v3849_v23 }
 0x24e   : > { %2713 = vmatmul.mubr.msk.bf16.vlgmr.msra.gmra.mrb[0].mxu0 %vm661_vm0, %v686_v25 }
 0x24f   : > { %2717 = vmatpush3.bf16.msra.mxu0 %v3017_v24  ;;  %2720 = vmatprep.mubr.msk.bf16.mxu0 %vm3412_vm1, %v3411_v8 }
 0x250   : > { %2718 = vmatprep.subr.bf16.mxu0 %v3411_v8 }
 0x253   : > { %2719 = vmatpush3.bf16.msra.mxu0 %v3018_v26 }
 0x254   : > { %2724 = vmatprep.subr.bf16.mxu0 %v3411_v8 }
 0x256   : > { %2721 = vmatmul.mubr.msk.bf16.vlgmr.msra.gmra.mrb[4].mxu0 %vm661_vm0, %v686_v25 }
 0x257   : > { %2725 = vmatpush3.bf16.msra.mxu0 %v3019_v27  ;;  %2728 = vmatprep.mubr.msk.bf16.mxu0 %vm3412_vm1, %v3411_v8 }
 0x258   : > { %2726 = vmatprep.subr.bf16.mxu0 %v3411_v8 }
 0x25b   : > { %2727 = vmatpush3.bf16.msra.mxu0 %v3020_v28 }
 0x25c   : > { %2738 = vmatprep.subr.bf16.mxu0 %v3411_v8 }
 0x25e   : > { %2729 = vmatmul.mubr.msk.bf16.vlgmr.msra.gmra.mrb[8].mxu0 %vm661_vm0, %v686_v25 }
 0x25f   : > { %2740 = vmatprep.mubr.msk.bf16.mxu0 %vm3412_vm1, %v3411_v8 }
 0x321   : > { %v740_v29 = vpop.f32.mrb[0].mxu0 }
 0x322   : > { %v865_v30 = vpack.c.bf16 %v740_v29, %v740_v29  ;;  %v2714_v31 = vpop.f32.mrb[1].mxu0 }
 0x323   : > { %v743_v32 = vpop.f32.mrb[2].mxu0 }
 0x324   : > { %869 = vrot.lane.b32.xlu0 %v865_v30, %s3413_s14  ;;  %v2715_v33 = vpop.f32.mrb[3].mxu0 }
 0x329   : > { %v797_v34 = vpop.f32.mrb[4].mxu0 }
 0x32a   : > { %v866_v35 = vpack.c.bf16 %v797_v34, %v797_v34  ;;  %v2722_v36 = vpop.f32.mrb[5].mxu0 }
 0x32b   : > { %v800_v37 = vpop.f32.mrb[6].mxu0 }
 0x32c   : > { %876 = vrot.lane.b32.xlu1 %v866_v35, %s3413_s14  ;;  %v2723_v38 = vpop.f32.mrb[7].mxu0  ;;  %v894_v39 = vsel %vm889_vm2, %v866_v35, 0 }
 0x32d   : > { %2733 = vmatpush3.bf16.xpose.msra.mxu1 %v894_v39 }
 0x32e   : > { %2744 = vmatprep.subr.bf16.mxu1 %v3411_v8 }
 0x330   : > { %878 = vrot.lane.b32.xlu1 %v866_v35, %s3414_s3 }
 0x331   : > { %v854_v40 = vpop.f32.mrb[8].mxu0 }
 0x332   : > { %v2730_v41 = vpop.f32.mrb[9].mxu0  ;;  %v3893_v50 = vpack.c.bf16 %v854_v40, %v854_v40 }
 0x333   : > { %v857_v42 = vpop.f32.mrb[10].mxu0 }
 0x334   : > { %880 = vrot.lane.b32.xlu1 %v866_v35, %s3415_s27  ;;  %v2731_v43 = vpop.f32.mrb[11].mxu0  ;;  %2735 = vmatmul.mubr.msk.bf16.vlgmr.msra.gmra.mrb[0].mxu1 %vm889_vm2, %v865_v30  ;;  %v1127_v53 = vsel %vm1125_vm3, %v3893_v50, 0 }
 0x335   : > { %2746 = vmatprep.mubr.msk.bf16.mxu1 %vm3412_vm1, %v3411_v8 }
 0x338   : > { %871 = vrot.lane.b32.xlu1 %v865_v30, %s3414_s3 }
 0x33c   : > { %873 = vrot.lane.b32.xlu1 %v865_v30, %s3415_s27 }
 0x396   : > { %v870_v48 = vpop.permute.xlu0 %869 }
 0x39e   : > { %v877_v44 = vpop.permute.xlu1 %876 }
 0x39f   : > { %v940_v45 = vsel %vm889_vm2, %v877_v44, 0 }
 0x3a0   : > { %2739 = vmatpush3.bf16.xpose.msra.mxu0 %v940_v45 }
 0x3a1   : > { %2750 = vmatprep.subr.bf16.mxu0 %v3411_v8 }
 0x3a2   : > { %v879_v46 = vpop.permute.xlu1 %878 }
 0x3a3   : > { %v986_v47 = vsel %vm889_vm2, %v879_v46, 0 }
 0x3a4   : > { %2745 = vmatpush3.bf16.xpose.msra.mxu1 %v986_v47 }
 0x3a5   : > { %2756 = vmatprep.subr.bf16.mxu1 %v3411_v8 }
 0x3a6   : > { %v881_v49 = vpop.permute.xlu1 %880 }
 0x3a7   : > { %v1032_v51 = vsel %vm889_vm2, %v881_v49, 0  ;;  %2741 = vmatmul.mubr.msk.bf16.vlgmr.msra.gmra.mrb[12].mxu0 %vm889_vm2, %v870_v48 }
 0x3a8   : > { %2751 = vmatpush3.bf16.xpose.msra.mxu0 %v1032_v51  ;;  %2752 = vmatprep.mubr.msk.bf16.mxu0 %vm3412_vm1, %v3411_v8 }
 0x3a9   : > { %2762 = vmatprep.subr.bf16.mxu0 %v3411_v8 }
 0x3aa   : > { %v872_v52 = vpop.permute.xlu1 %871 }
 0x3ab   : > { %2747 = vmatmul.mubr.msk.bf16.vlgmr.msra.gmra.mrb[4].mxu1 %vm889_vm2, %v872_v52 }
 0x3ac   : > { %2757 = vmatpush3.bf16.msra.mxu1 %v1127_v53  ;;  %2758 = vmatprep.mubr.msk.bf16.mxu1 %vm3412_vm1, %v3411_v8 }
 0x3ad   : > { %2768 = vmatprep.subr.bf16.mxu1 %v3411_v8 }
 0x3ae   : > { %v874_v54 = vpop.permute.xlu1 %873 }
 0x3af   : > { %2753 = vmatmul.mubr.msk.bf16.vlgmr.msra.gmra.mrb[16].mxu0 %vm889_vm2, %v874_v54 }
 0x3b0   : > { %2764 = vmatprep.mubr.msk.bf16.mxu0 %vm3412_vm1, %v3411_v8 }
 0x407   : > { %v930_v56 = vpop.f32.mrb[0].mxu1 }
 0x408   : > { %v931_v57 = vadd.f32 %v930_v56, %v3909_v55  ;;  %v2736_v58 = vpop.f32.mrb[1].mxu1 }
 0x409   : > { %v933_v59 = vpop.f32.mrb[2].mxu1 }
 0x40a   : > { %v2737_v60 = vpop.f32.mrb[3].mxu1  ;;  %v1074_v61 = vsel %vm889_vm2, %v931_v57, -inf }
 0x40b   : > { %1075 = vmax.xlane.f32.xlu1 %v1074_v61 }
 0x47a   : > { %v976_v62 = vpop.f32.mrb[12].mxu0 }
 0x47b   : > { %v977_v63 = vadd.f32 %v976_v62, %v3909_v55  ;;  %v2742_v0 = vpop.f32.mrb[13].mxu0 }
 0x47c   : > { %v979_v1 = vpop.f32.mrb[14].mxu0 }
 0x47d   : > { %v2743_v2 = vpop.f32.mrb[15].mxu0  ;;  %v1077_v3 = vsel %vm889_vm2, %v977_v63, -inf }
 0x47e   : > { %v1022_v4 = vpop.f32.mrb[4].mxu1  ;;  %1078 = vmax.xlane.f32.xlu0 %v1077_v3  ;;  %v3021_v3 = vld [vmem:[#allocation11] sm:$0xff]  }
 0x47f   : > { %v1023_v5 = vadd.f32 %v1022_v4, %v3909_v55  ;;  %v2748_v6 = vpop.f32.mrb[5].mxu1 }
 0x480   : > { %v1025_v7 = vpop.f32.mrb[6].mxu1 }
 0x481   : > { %v2749_v9 = vpop.f32.mrb[7].mxu1  ;;  %v1080_v10 = vsel %vm889_vm2, %v1023_v5, -inf }
 0x482   : > { %1081 = vmax.xlane.f32.xlu1 %v1080_v10  ;;  %v1068_v11 = vpop.f32.mrb[16].mxu0 }
 0x483   : > { %v1069_v12 = vadd.f32 %v1068_v11, %v3909_v55  ;;  %v2754_v13 = vpop.f32.mrb[17].mxu0 }
 0x484   : > { %v1071_v14 = vpop.f32.mrb[18].mxu0  ;;  %v3022_v13 = vld [vmem:[#allocation11 + $0x8] sm:$0xff]  }
 0x485   : > { %v2755_v16 = vpop.f32.mrb[19].mxu0  ;;  %v1083_v18 = vsel %vm889_vm2, %v1069_v12, -inf  ;;  %v655_v14 = vld [vmem:[%s575_s16] sm:$0xff]  ;;  %s3319_s16 = sshll.u32 %s3419_s24, 4  ;;  %s3320_s16 = int_to_ptr.vmem [resolvable:$false] %s3319_s16 }
 0x486   : > { %1084 = vmax.xlane.f32.xlu1 %v1083_v18  ;;  %v1411_v16 = vsel %vm661_vm0, %v655_v14, 0.0  ;;  %s3321_s10 = scalar_lea.vmem %s3320_s16, 256 }
 0x498   : > { %v1076_v19 = vpop.xlane.xlu1 %1075 }
 0x499   : > { %v1086_v20 = vsub.f32 %v931_v57, %v1076_v19 }
 0x49b   : > { %v1090_v21 = vmul.f32 1.442695, %v1086_v20 }
 0x49d   : > { %3043 = vpow2.f32 %v1090_v21 }
 0x4a7   : > { %v3044_v22 = vpop.eup %3043 }
 0x4a8   : > { %v1098_v24 = vsel %vm889_vm2, %v3044_v22, 0.0 }
 0x4a9   : > { %1099 = vadd.xlane.f32.xlu0 %v1098_v24 }
 0x50b   : > { %v1079_v25 = vpop.xlane.xlu0 %1078 }
 0x50c   : > { %v1087_v26 = vsub.f32 %v977_v63, %v1079_v25 }
 0x50e   : > { %v1092_v27 = vmul.f32 1.442695, %v1087_v26 }
 0x50f   : > { %v1082_v28 = vpop.xlane.xlu1 %1081 }
 0x510   : > { %3045 = vpow2.f32 %v1092_v27  ;;  %v1088_v29 = vsub.f32 %v1023_v5, %v1082_v28 }
 0x512   : > { %v1094_v30 = vmul.f32 1.442695, %v1088_v29 }
 0x513   : > { %v1085_v36 = vpop.xlane.xlu1 %1084 }
 0x514   : > { %3047 = vpow2.f32 %v1094_v30  ;;  %v1089_v37 = vsub.f32 %v1069_v12, %v1085_v36 }
 0x516   : > { %v1096_v38 = vmul.f32 1.442695, %v1089_v37 }
 0x51a   : > { %v3046_v31 = vpop.eup %3045 }
 0x51b   : > { %v1101_v32 = vsel %vm889_vm2, %v3046_v31, 0.0 }
 0x51c   : > { %1102 = vadd.xlane.f32.xlu1 %v1101_v32  ;;  %v2590_v32 = vld [vmem:[%s4291_s15] ss:$0 sm:$0xff] }
 0x51e   : > { %v3048_v33 = vpop.eup %3047 }
 0x51f   : > { %v1104_v34 = vsel %vm889_vm2, %v3048_v33, 0.0 }
 0x520   : > { %1105 = vadd.xlane.f32.xlu0 %v1104_v34 }
 0x52d   : > { %885 = vrot.lane.b32.xlu1 %v3893_v50, %s3414_s3 }
 0x536   : > { %883 = vrot.lane.b32.xlu0 %v3893_v50, %s3413_s14  ;;  %v1100_v35 = vpop.xlane.xlu0 %1099 }
 0x537   : > { %3049 = vrcp.f32 %v1100_v35 }
 0x538   : > { %3051 = vpow2.f32 %v1096_v38 }
 0x541   : > { %v3050_v39 = vpop.eup %3049 }
 0x542   : > { %v1114_v40 = vmul.f32 %v3050_v39, %v3044_v22  ;;  %v3052_v42 = vpop.eup %3051 }
 0x543   : > { %v1107_v43 = vsel %vm889_vm2, %v3052_v42, 0.0 }
 0x544   : > { %v1118_v41 = vpack.c.bf16 %v1114_v40, %v1114_v40 }
 0x546   : > { %2759 = vmatmul.mubr.msk.bf16.vlgmr.msra.gmra.mrb[8].mxu1 %vm889_vm2, %v1118_v41 }
 0x547   : > { %2770 = vmatprep.mubr.msk.bf16.mxu1 %vm3412_vm1, %v3411_v8 }
 0x551   : > { %1108 = vadd.xlane.f32.xlu1 %v1107_v43  ;;  %v654_v43 = vld [vmem:[%s566_s6] sm:$0xff]  ;;  %s2380_s6 = sshll.u32 %s651_s5, 4  ;;  %s4150_s6 = int_to_ptr.vmem [resolvable:$true] %s2380_s6 }
 0x552   : > { %s3315_s18 = scalar_lea.vmem %s4150_s6, 128  ;;  %p3322_p0 = scmp.lt.s32.totalorder %s4150_s6, %s3320_s16 }
 0x553   : > { %p3316_p7 = scmp.ne.s32.totalorder %s4150_s6, %s3315_s18  ;;  %p3323_p13 = scmp.lt.s32.totalorder %s3321_s10, %s3315_s18 }
 0x555   : > { %p3317_p11 = pnand %p3316_p7, %p4299_p8  ;;  %p3324_p3 = por %p3323_p13, %p3322_p0 }
 0x557   : > { %p3318_p5 = pneg %p3317_p11 }
 0x559   : > { %p3325_p2 = pnand %p3324_p3, %p3318_p5 }
 0x562   : > { %887 = vrot.lane.b32.xlu1 %v3893_v50, %s3415_s27 }
 0x5a9   : > { %v1103_v44 = vpop.xlane.xlu1 %1102 }
 0x5aa   : > { %3053 = vrcp.f32 %v1103_v44  ;;  %v1387_v44 = vsel %vm661_vm0, %v654_v43, 0.0 }
 0x5ad   : > { %v1106_v45 = vpop.xlane.xlu0 %1105  ;;  %v886_v46 = vpop.permute.xlu1 %885 }
 0x5ae   : > { %3055 = vrcp.f32 %v1106_v45  ;;  %v1219_v47 = vsel %vm1125_vm3, %v886_v46, 0  ;;  %v3023_v45 = vld [vmem:[%s4292_s1 + $0x10] sm:$0xff]  }
 0x5af   : > { %2769 = vmatpush3.bf16.msra.mxu1 %v1219_v47 }
 0x5b0   : > { %2780 = vmatprep.subr.bf16.mxu1 %v3411_v8 }
 0x5b1   : > { %v884_v48 = vpop.permute.xlu0 %883 }
 0x5b2   : > { %v1173_v49 = vsel %vm1125_vm3, %v884_v48, 0 }
 0x5b3   : > { %2763 = vmatpush3.bf16.msra.mxu0 %v1173_v49 }
 0x5b4   : > { %v3054_v51 = vpop.eup %3053  ;;  %2774 = vmatprep.subr.bf16.mxu0 %v3411_v8 }
 0x5b5   : > { %v1115_v52 = vmul.f32 %v3054_v51, %v3046_v31 }
 0x5b7   : > { %v1119_v53 = vpack.c.bf16 %v1115_v52, %v1115_v52 }
 0x5b8   : > { %v3056_v50 = vpop.eup %3055 }
 0x5b9   : > { %v1116_v54 = vmul.f32 %v3056_v50, %v3048_v33  ;;  %2765 = vmatmul.mubr.msk.bf16.vlgmr.msra.gmra.mrb[20].mxu0 %vm889_vm2, %v1119_v53 }
 0x5ba   : > { %2776 = vmatprep.mubr.msk.bf16.mxu0 %vm3412_vm1, %v3411_v8 }
 0x5bb   : > { %v1120_v56 = vpack.c.bf16 %v1116_v54, %v1116_v54  ;;  %v659_v54 = vld [vmem:[#allocation10 + $0x4] sm:$0x3] }
 0x5bd   : > { %2771 = vmatmul.mubr.msk.bf16.vlgmr.msra.gmra.mrb[12].mxu1 %vm889_vm2, %v1120_v56  ;;  %v1403_v56 = vrot.slane %v659_v54, %v3843_v15 }
 0x5be   : > { %2784 = vmatprep.mubr.msk.bf16.mxu1 %vm3412_vm1, %v3411_v8  ;;  %2781 = vmatpush3.bf16.msra.mxu1 %v3021_v3  ;;  %v3025_v3 = vld [vmem:[%s4292_s1] sm:$0xff]  }
 0x5bf   : > { %2782 = vmatprep.subr.bf16.mxu1 %v3411_v8 }
 0x5c2   : > { %2783 = vmatpush3.bf16.msra.mxu1 %v3022_v13 }
 0x5c3   : > { %2796 = vmatprep.subr.bf16.mxu1 %v3411_v8 }
 0x5de   : > { %v1109_v57 = vpop.xlane.xlu1 %1108 }
 0x5df   : > { %3057 = vrcp.f32 %v1109_v57 }
 0x5e2   : > { %v888_v58 = vpop.permute.xlu1 %887 }
 0x5e3   : > { %v1265_v59 = vsel %vm1125_vm3, %v888_v58, 0 }
 0x5e4   : > { %2775 = vmatpush3.bf16.msra.mxu0 %v1265_v59  ;;  %v1408_v59 = vrot.slane %v659_v54, %v3845_v17 }
 0x5e5   : > { %2788 = vmatprep.subr.bf16.mxu0 %v3411_v8 }
 0x5e9   : > { %v3058_v60 = vpop.eup %3057 }
 0x5ea   : > { %v1117_v61 = vmul.f32 %v3058_v60, %v3052_v42 }
 0x5ec   : > { %v1121_v62 = vpack.c.bf16 %v1117_v61, %v1117_v61 }
 0x5ee   : > { %2777 = vmatmul.mubr.msk.bf16.vlgmr.msra.gmra.mrb[24].mxu0 %vm889_vm2, %v1121_v62 }
 0x5ef   : > { %2792 = vmatprep.mubr.msk.bf16.mxu0 %vm3412_vm1, %v3411_v8  ;;  %2789 = vmatpush3.bf16.msra.mxu0 %v3025_v3 }
 0x5f0   : > { %2790 = vmatprep.subr.bf16.mxu0 %v3411_v8 }
 0x619   : > { %v1163_v63 = vpop.f32.mrb[8].mxu1 }
 0x61a   : > { %v2760_v0 = vpop.f32.mrb[9].mxu1 }
 0x61b   : > { %v1166_v1 = vpop.f32.mrb[10].mxu1 }
 0x61c   : > { %v2761_v2 = vpop.f32.mrb[11].mxu1 }
 0x68c   : > { %v1209_v4 = vpop.f32.mrb[20].mxu0 }
 0x68d   : > { %1308 = vrot.lane.b32.xlu0 %v1209_v4, %s3416_s26  ;;  %v2766_v5 = vpop.f32.mrb[21].mxu0 }
 0x68e   : > { %v1212_v6 = vpop.f32.mrb[22].mxu0  ;;  %v3026_v5 = vld [vmem:[%s4292_s1 + $0x8] sm:$0xff]  }
 0x68f   : > { %v2767_v7 = vpop.f32.mrb[23].mxu0  ;;  %2791 = vmatpush3.bf16.msra.mxu0 %v3026_v5 }
 0x690   : > { %v1255_v9 = vpop.f32.mrb[12].mxu1  ;;  %2804 = vmatprep.subr.bf16.mxu0 %v3411_v8 }
 0x691   : > { %1312 = vrot.lane.b32.xlu1 %v1255_v9, %s3417_s25  ;;  %v2772_v10 = vpop.f32.mrb[13].mxu1 }
 0x692   : > { %v1258_v11 = vpop.f32.mrb[14].mxu1  ;;  %v658_v10 = vld [vmem:[#allocation10 + $0x2] sm:$0x3] }
 0x693   : > { %v2773_v12 = vpop.f32.mrb[15].mxu1  ;;  %v1443_v11 = vrot.slane %v658_v10, %v3843_v15 }
 0x6b5   : > { %1412 = vadd.xlane.f32.xlu1 %v1411_v16 }
 0x6c1   : > { %v1301_v18 = vpop.f32.mrb[24].mxu0 }
 0x6c2   : > { %1316 = vrot.lane.b32.xlu0 %v1301_v18, %s3418_s12  ;;  %v2778_v19 = vpop.f32.mrb[25].mxu0 }
 0x6c3   : > { %v1304_v20 = vpop.f32.mrb[26].mxu0  ;;  %v3027_v19 = vld [vmem:[%s4292_s1 + $0x20] sm:$0xff]  }
 0x6c4   : > { %v2779_v21 = vpop.f32.mrb[27].mxu0 }
 0x6c5   : > { %v3028_v21 = vld [vmem:[%s4292_s1 + $0x28] sm:$0xff]  }
 0x6ff   : > { %v1309_v22 = vpop.permute.xlu0 %1308 }
 0x700   : > { %v1319_v25 = vsel %vm889_vm2, %v1163_v63, %v1309_v22 }
 0x703   : > { %v1313_v24 = vpop.permute.xlu1 %1312 }
 0x704   : > { %v1321_v26 = vsel %vm1320_vm4, %v1319_v25, %v1313_v24 }
 0x734   : > { %v1317_v27 = vpop.permute.xlu0 %1316 }
 0x735   : > { %v1323_v28 = vsel %vm1322_vm5, %v1321_v26, %v1317_v27 }
 0x736   : > { %v1324_v29 = vpack.c.bf16 %v1323_v28, %v1323_v28 }
 0x738   : > { %2785 = vmatmul.mubr.msk.bf16.vlgmr.msra.gmra.mrb[16].mxu1 %vm661_vm0, %v1324_v29 }
 0x739   : > { %2800 = vmatprep.mubr.msk.bf16.mxu1 %vm3412_vm1, %v3411_v8  ;;  %2797 = vmatpush3.bf16.msra.mxu1 %v3023_v45 }
 0x73a   : > { %2798 = vmatprep.subr.bf16.mxu1 %v3411_v8 }
 0x742   : > { %v1413_v30 = vpop.xlane.xlu1 %1412 }
 0x743   : > { %v1414_v31 = vmul.f32 0.03125, %v1413_v30 }
 0x745   : > { %v1415_v33 = vsub.f32 %v655_v14, %v1414_v31  ;;  %v1448_v14 = vrot.slane %v658_v10, %v3845_v17 }
 0x747   : > { %v1416_v40 = vmul.f32 %v1415_v33, %v1415_v33 }
 0x749   : > { %v1417_v42 = vsel %vm661_vm0, %v1416_v40, 0.0 }
 0x80b   : > { %v1380_v34 = vpop.f32.mrb[16].mxu1 }
 0x80c   : > { %v1381_v35 = vadd.f32 %v2590_v32, %v1380_v34  ;;  %v2786_v36 = vpop.f32.mrb[17].mxu1 }
 0x80d   : > { %v1383_v37 = vpop.f32.mrb[18].mxu1 }
 0x80e   : > { %v2787_v38 = vpop.f32.mrb[19].mxu1  ;;  %v1386_v39 = vadd.f32 %v1381_v35, %v3849_v23  ;;  %v3024_v23 = vld [vmem:[%s4292_s1 + $0x18] sm:$0xff]  }
 0x80f   : > { %2799 = vmatpush3.bf16.msra.mxu1 %v3024_v23 }
 0x810   : > { %v1427_v41 = vsel %vm661_vm0, %v1386_v39, 0.0  ;;  %2812 = vmatprep.subr.bf16.mxu1 %v3411_v8 }
 0x811   : > { %1428 = vadd.xlane.f32.xlu0 %v1427_v41 }
 0x815   : > { %1418 = vadd.xlane.f32.xlu0 %v1417_v42 }
 0x819   : > { %1388 = vadd.xlane.f32.xlu0 %v1387_v44 }
 0x89e   : > { %v1429_v46 = vpop.xlane.xlu0 %1428 }
 0x89f   : > { %v1430_v47 = vmul.f32 0.03125, %v1429_v46 }
 0x8a1   : > { %v1431_v48 = vsub.f32 %v1386_v39, %v1430_v47 }
 0x8a2   : > { %v1419_v49 = vpop.xlane.xlu0 %1418 }
 0x8a3   : > { %v1420_v51 = vmul.f32 0.03125, %v1419_v49  ;;  %v1432_v52 = vmul.f32 %v1431_v48, %v1431_v48 }
 0x8a5   : > { %v1421_v53 = vadd.f32 1e-05, %v1420_v51  ;;  %v1433_v50 = vsel %vm661_vm0, %v1432_v52, 0.0 }
 0x8a6   : > { %1434 = vadd.xlane.f32.xlu1 %v1433_v50  ;;  %v1389_v63 = vpop.xlane.xlu0 %1388 }
 0x8a7   : > { %3059 = vrsqrt.f32 %v1421_v53  ;;  %v1390_v0 = vmul.f32 0.03125, %v1389_v63 }
 0x8a9   : > { %v1391_v1 = vsub.f32 %v654_v43, %v1390_v0 }
 0x8ab   : > { %v1392_v2 = vmul.f32 %v1391_v1, %v1391_v1 }
 0x8ad   : > { %v1393_v4 = vsel %vm661_vm0, %v1392_v2, 0.0 }
 0x8ae   : > { %1394 = vadd.xlane.f32.xlu1 %v1393_v4 }
 0x8b1   : > { %v3060_v57 = vpop.eup %3059 }
 0x8b2   : > { %v1423_v58 = vmul.f32 %v3060_v57, %v1415_v33 }
 0x8b4   : > { %v1424_v60 = vmul.f32 %v1423_v58, %v1403_v56 }
 0x8b6   : > { %v1425_v61 = vadd.f32 %v1424_v60, %v1408_v59 }
 0x8b8   : > { %v1426_v62 = vpack.c.bf16 %v1425_v61, %v1425_v61 }
 0x8ba   : > { %2801 = vmatmul.mubr.msk.bf16.vlgmr.msra.gmra.mrb[20].mxu1 %vm661_vm0, %v1426_v62 }
 0x8bb   : > { %2814 = vmatprep.mubr.msk.bf16.mxu1 %vm3412_vm1, %v3411_v8 }
 0x933   : > { %v1435_v6 = vpop.xlane.xlu1 %1434 }
 0x934   : > { %v1436_v7 = vmul.f32 0.03125, %v1435_v6 }
 0x936   : > { %v1437_v9 = vadd.f32 1e-05, %v1436_v7 }
 0x938   : > { %3061 = vrsqrt.f32 %v1437_v9 }
 0x93b   : > { %v1395_v22 = vpop.xlane.xlu1 %1394 }
 0x93c   : > { %v1396_v24 = vmul.f32 0.03125, %v1395_v22 }
 0x93e   : > { %v1397_v25 = vadd.f32 1e-05, %v1396_v24 }
 0x940   : > { %3063 = vrsqrt.f32 %v1397_v25 }
 0x942   : > { %v3062_v12 = vpop.eup %3061 }
 0x943   : > { %v1439_v13 = vmul.f32 %v3062_v12, %v1431_v48 }
 0x945   : > { %v1444_v16 = vmul.f32 %v1443_v11, %v1439_v13 }
 0x947   : > { %v3995_v18 = vadd.f32 %v1448_v14, %v1444_v16 }
 0x949   : > { %v1450_v20 = vpack.c.bf16 %v3995_v18, %v3995_v18 }
 0x94a   : > { %v3064_v26 = vpop.eup %3063 }
 0x94b   : > { %2793 = vmatmul.mubr.msk.bf16.vlgmr.msra.gmra.mrb[28].mxu0 %vm661_vm0, %v1450_v20  ;;  %v1399_v27 = vmul.f32 %v3064_v26, %v1391_v1 }
 0x94c   : > { %2805 = vmatpush3.bf16.msra.mxu0 %v3027_v19  ;;  %2808 = vmatprep.mubr.msk.bf16.mxu0 %vm3412_vm1, %v3411_v8 }
 0x94d   : > { %2806 = vmatprep.subr.bf16.mxu0 %v3411_v8  ;;  %v1404_v28 = vmul.f32 %v1403_v56, %v1399_v27 }
 0x94f   : > { %v1409_v29 = vadd.f32 %v1408_v59, %v1404_v28 }
 0x950   : > { %2807 = vmatpush3.bf16.msra.mxu0 %v3028_v21 }
 0x951   : > { %2818 = vmatprep.subr.bf16.mxu0 %v3411_v8  ;;  %v1410_v30 = vpack.c.bf16 %v1409_v29, %v1409_v29 }
 0x953   : > { %2809 = vmatmul.mubr.msk.bf16.vlgmr.msra.gmra.mrb[32].mxu0 %vm661_vm0, %v1410_v30 }
 0x954   : > { %2820 = vmatprep.mubr.msk.bf16.mxu0 %vm3412_vm1, %v3411_v8 }
 0x98d   : > { %v1564_v31 = vpop.f32.mrb[20].mxu1 }
 0x98e   : > { %v1636_v32 = vpack.c.bf16 %v1564_v31, %v1564_v31  ;;  %v2802_v33 = vpop.f32.mrb[21].mxu1 }
 0x98f   : > { %v1567_v34 = vpop.f32.mrb[22].mxu1 }
 0x990   : > { %1648 = vrot.lane.b32.xlu1 %v1636_v32, %s3414_s3  ;;  %1646 = vrot.lane.b32.xlu0 %v1636_v32, %s3413_s14  ;;  %v2803_v35 = vpop.f32.mrb[23].mxu1  ;;  %v1663_v36 = vsel %vm889_vm2, %v1636_v32, 0 }
 0x991   : > { %2813 = vmatpush3.bf16.xpose.msra.mxu1 %v1663_v36 }
 0x992   : > { %2824 = vmatprep.subr.bf16.mxu1 %v3411_v8 }
 0x994   : > { %1650 = vrot.lane.b32.xlu0 %v1636_v32, %s3415_s27 }
 0xa02   : > { %v1647_v37 = vpop.permute.xlu0 %1646  ;;  %v1649_v40 = vpop.permute.xlu1 %1648 }
 0xa03   : > { %v1709_v38 = vsel %vm889_vm2, %v1647_v37, 0  ;;  %v1755_v45 = vsel %vm889_vm2, %v1649_v40, 0 }
 0xa04   : > { %2819 = vmatpush3.bf16.xpose.msra.mxu0 %v1709_v38 }
 0xa05   : > { %2830 = vmatprep.subr.bf16.mxu0 %v3411_v8 }
 0xa06   : > { %v1651_v49 = vpop.permute.xlu0 %1650 }
 0xa07   : > { %v1801_v53 = vsel %vm889_vm2, %v1651_v49, 0 }
 0xa1e   : > { %v1504_v39 = vpop.f32.mrb[28].mxu0 }
 0xa1f   : > { %v1635_v41 = vpack.c.bf16 %v1504_v39, %v1504_v39  ;;  %v2794_v42 = vpop.f32.mrb[29].mxu0 }
 0xa20   : > { %v1507_v43 = vpop.f32.mrb[30].mxu0 }
 0xa21   : > { %1643 = vrot.lane.b32.xlu0 %v1635_v41, %s3415_s27  ;;  %1639 = vrot.lane.b32.xlu1 %v1635_v41, %s3413_s14  ;;  %v2795_v44 = vpop.f32.mrb[31].mxu0 }
 0xa22   : > { %2815 = vmatmul.mubr.msk.bf16.vlgmr.msra.gmra.mrb[24].mxu1 %vm889_vm2, %v1635_v41 }
 0xa23   : > { %2825 = vmatpush3.bf16.xpose.msra.mxu1 %v1755_v45  ;;  %2826 = vmatprep.mubr.msk.bf16.mxu1 %vm3412_vm1, %v3411_v8 }
 0xa24   : > { %2836 = vmatprep.subr.bf16.mxu1 %v3411_v8 }
 0xa25   : > { %1641 = vrot.lane.b32.xlu1 %v1635_v41, %s3414_s3 }
 0xa26   : > { %v1624_v23 = vpop.f32.mrb[32].mxu0 }
 0xa27   : > { %v2810_v46 = vpop.f32.mrb[33].mxu0  ;;  %v4028_v51 = vpack.c.bf16 %v1624_v23, %v1624_v23 }
 0xa28   : > { %v1627_v47 = vpop.f32.mrb[34].mxu0 }
 0xa29   : > { %v2811_v48 = vpop.f32.mrb[35].mxu0  ;;  %v1895_v50 = vsel %vm1125_vm3, %v4028_v51, 0 }
 0xa93   : > { %v1640_v52 = vpop.permute.xlu1 %1639  ;;  %v1644_v56 = vpop.permute.xlu0 %1643 }
 0xa94   : > { %2821 = vmatmul.mubr.msk.bf16.vlgmr.msra.gmra.mrb[36].mxu0 %vm889_vm2, %v1640_v52 }
 0xa95   : > { %2831 = vmatpush3.bf16.xpose.msra.mxu0 %v1801_v53  ;;  %2832 = vmatprep.mubr.msk.bf16.mxu0 %vm3412_vm1, %v3411_v8 }
 0xa96   : > { %2842 = vmatprep.subr.bf16.mxu0 %v3411_v8 }
 0xa97   : > { %v1642_v54 = vpop.permute.xlu1 %1641 }
 0xa98   : > { %2827 = vmatmul.mubr.msk.bf16.vlgmr.msra.gmra.mrb[28].mxu1 %vm889_vm2, %v1642_v54 }
 0xa99   : > { %2837 = vmatpush3.bf16.msra.mxu1 %v1895_v50  ;;  %2838 = vmatprep.mubr.msk.bf16.mxu1 %vm3412_vm1, %v3411_v8 }
 0xa9a   : > { %2848 = vmatprep.subr.bf16.mxu1 %v3411_v8 }
 0xa9c   : > { %2833 = vmatmul.mubr.msk.bf16.vlgmr.msra.gmra.mrb[40].mxu0 %vm889_vm2, %v1644_v56 }
 0xa9d   : > { %2844 = vmatprep.mubr.msk.bf16.mxu0 %vm3412_vm1, %v3411_v8 }
 0xaf5   : > { %v1699_v57 = vpop.f32.mrb[24].mxu1 }
 0xaf6   : > { %v1700_v58 = vadd.f32 %v1699_v57, %v3909_v55  ;;  %v2816_v59 = vpop.f32.mrb[25].mxu1 }
 0xaf7   : > { %v1702_v60 = vpop.f32.mrb[26].mxu1 }
 0xaf8   : > { %v2817_v61 = vpop.f32.mrb[27].mxu1  ;;  %v1843_v62 = vsel %vm889_vm2, %v1700_v58, -inf }
 0xaf9   : > { %1844 = vmax.xlane.f32.xlu1 %v1843_v62 }
 0xb67   : > { %v1745_v63 = vpop.f32.mrb[36].mxu0 }
 0xb68   : > { %v1746_v0 = vadd.f32 %v1745_v63, %v3909_v55  ;;  %v2822_v1 = vpop.f32.mrb[37].mxu0 }
 0xb69   : > { %v1748_v2 = vpop.f32.mrb[38].mxu0 }
 0xb6a   : > { %v2823_v3 = vpop.f32.mrb[39].mxu0  ;;  %v1846_v4 = vsel %vm889_vm2, %v1746_v0, -inf }
 0xb6b   : > { %v1791_v5 = vpop.f32.mrb[28].mxu1  ;;  %1847 = vmax.xlane.f32.xlu0 %v1846_v4  ;;  %v3029_v3 = vld [vmem:[#allocation13] sm:$0xff]  }
 0xb6c   : > { %v1792_v6 = vadd.f32 %v1791_v5, %v3909_v55  ;;  %v2828_v7 = vpop.f32.mrb[29].mxu1 }
 0xb6d   : > { %v1794_v9 = vpop.f32.mrb[30].mxu1 }
 0xb6e   : > { %v2829_v10 = vpop.f32.mrb[31].mxu1  ;;  %v1849_v11 = vsel %vm889_vm2, %v1792_v6, -inf }
 0xb6f   : > { %1850 = vmax.xlane.f32.xlu0 %v1849_v11  ;;  %v1837_v12 = vpop.f32.mrb[40].mxu0 }
 0xb70   : > { %v1838_v13 = vadd.f32 %v1837_v12, %v3909_v55  ;;  %v2834_v14 = vpop.f32.mrb[41].mxu0 }
 0xb71   : > { %v1840_v16 = vpop.f32.mrb[42].mxu0 }
 0xb72   : > { %v2835_v19 = vpop.f32.mrb[43].mxu0  ;;  %v1852_v20 = vsel %vm889_vm2, %v1838_v13, -inf }
 0xb73   : > { %1853 = vmax.xlane.f32.xlu1 %v1852_v20 }
 0xb86   : > { %v1845_v21 = vpop.xlane.xlu1 %1844 }
 0xb87   : > { %v1855_v22 = vsub.f32 %v1700_v58, %v1845_v21 }
 0xb89   : > { %v1859_v24 = vmul.f32 1.442695, %v1855_v22 }
 0xb8b   : > { %3065 = vpow2.f32 %v1859_v24 }
 0xb95   : > { %v3066_v25 = vpop.eup %3065 }
 0xb96   : > { %v1867_v26 = vsel %vm889_vm2, %v3066_v25, 0.0 }
 0xb97   : > { %1868 = vadd.xlane.f32.xlu0 %v1867_v26 }
 0xbf8   : > { %v1848_v27 = vpop.xlane.xlu0 %1847 }
 0xbf9   : > { %v1856_v28 = vsub.f32 %v1746_v0, %v1848_v27 }
 0xbfb   : > { %v1861_v29 = vmul.f32 1.442695, %v1856_v28 }
 0xbfc   : > { %v1851_v30 = vpop.xlane.xlu0 %1850 }
 0xbfd   : > { %3067 = vpow2.f32 %v1861_v29  ;;  %v1857_v55 = vsub.f32 %v1792_v6, %v1851_v30 }
 0xbff   : > { %v1863_v31 = vmul.f32 1.442695, %v1857_v55 }
 0xc00   : > { %v1854_v37 = vpop.xlane.xlu1 %1853 }
 0xc01   : > { %3069 = vpow2.f32 %v1863_v31  ;;  %v1858_v38 = vsub.f32 %v1838_v13, %v1854_v37  ;;  %v3030_v13 = vld [vmem:[#allocation13 + $0x8] sm:$0xff]  }
 0xc03   : > { %v1865_v39 = vmul.f32 1.442695, %v1858_v38 }
 0xc07   : > { %v3068_v32 = vpop.eup %3067 }
 0xc08   : > { %v1870_v33 = vsel %vm889_vm2, %v3068_v32, 0.0 }
 0xc09   : > { %1871 = vadd.xlane.f32.xlu1 %v1870_v33 }
 0xc0b   : > { %v3070_v34 = vpop.eup %3069 }
 0xc0c   : > { %v1873_v35 = vsel %vm889_vm2, %v3070_v34, 0.0 }
 0xc0d   : > { %1874 = vadd.xlane.f32.xlu0 %v1873_v35 }
 0xc1a   : > { %1655 = vrot.lane.b32.xlu1 %v4028_v51, %s3414_s3 }
 0xc23   : > { %1653 = vrot.lane.b32.xlu0 %v4028_v51, %s3413_s14 }
 0xc24   : > { %v1869_v36 = vpop.xlane.xlu0 %1868 }
 0xc25   : > { %3071 = vrcp.f32 %v1869_v36 }
 0xc26   : > { %3073 = vpow2.f32 %v1865_v39 }
 0xc2f   : > { %v3072_v40 = vpop.eup %3071 }
 0xc30   : > { %v1883_v41 = vmul.f32 %v3072_v40, %v3066_v25  ;;  %v3074_v43 = vpop.eup %3073 }
 0xc31   : > { %v1876_v44 = vsel %vm889_vm2, %v3074_v43, 0.0 }
 0xc32   : > { %v1887_v42 = vpack.c.bf16 %v1883_v41, %v1883_v41  ;;  %v3031_v41 = vld [vmem:[#allocation14] sm:$0xff]  }
 0xc34   : > { %2839 = vmatmul.mubr.msk.bf16.vlgmr.msra.gmra.mrb[32].mxu1 %vm889_vm2, %v1887_v42  ;;  %v3032_v42 = vld [vmem:[#allocation14 + $0x8] sm:$0xff]  }
 0xc35   : > { %2850 = vmatprep.mubr.msk.bf16.mxu1 %vm3412_vm1, %v3411_v8 }
 0xc3e   : > { %1877 = vadd.xlane.f32.xlu1 %v1876_v44 }
 0xc4f   : > { %1657 = vrot.lane.b32.xlu1 %v4028_v51, %s3415_s27  ;;  %s4293_s27 = sld [smem:[#allocation37_spill]] }
 0xc55   : > { %v2619_v29 = vld [vmem:[%s4293_s27] ss:$0 sm:$0xff] }
 0xc96   : > { %v1872_v45 = vpop.xlane.xlu1 %1871 }
 0xc97   : > { %3075 = vrcp.f32 %v1872_v45 }
 0xc9a   : > { %v1875_v23 = vpop.xlane.xlu0 %1874  ;;  %v1656_v46 = vpop.permute.xlu1 %1655 }
 0xc9b   : > { %3077 = vrcp.f32 %v1875_v23  ;;  %v1987_v47 = vsel %vm1125_vm3, %v1656_v46, 0  ;;  %v660_v23 = vld [vmem:[#allocation10 + $0x6] sm:$0x3] }
 0xc9c   : > { %2849 = vmatpush3.bf16.msra.mxu1 %v1987_v47  ;;  %v2169_v46 = vrot.slane %v660_v23, %v3843_v15 }
 0xc9d   : > { %2860 = vmatprep.subr.bf16.mxu1 %v3411_v8 }
 0xc9e   : > { %v1654_v48 = vpop.permute.xlu0 %1653 }
 0xc9f   : > { %v1941_v49 = vsel %vm1125_vm3, %v1654_v48, 0 }
 0xca0   : > { %2843 = vmatpush3.bf16.msra.mxu0 %v1941_v49  ;;  %v2174_v49 = vrot.slane %v660_v23, %v3845_v17 }
 0xca1   : > { %v3076_v52 = vpop.eup %3075  ;;  %2854 = vmatprep.subr.bf16.mxu0 %v3411_v8 }
 0xca2   : > { %v1884_v53 = vmul.f32 %v3076_v52, %v3068_v32 }
 0xca4   : > { %v1888_v50 = vpack.c.bf16 %v1884_v53, %v1884_v53 }
 0xca5   : > { %v3078_v51 = vpop.eup %3077 }
 0xca6   : > { %v1885_v54 = vmul.f32 %v3078_v51, %v3070_v34  ;;  %2845 = vmatmul.mubr.msk.bf16.vlgmr.msra.gmra.mrb[44].mxu0 %vm889_vm2, %v1888_v50 }
 0xca7   : > { %2856 = vmatprep.mubr.msk.bf16.mxu0 %vm3412_vm1, %v3411_v8 }
 0xca8   : > { %v1889_v56 = vpack.c.bf16 %v1885_v54, %v1885_v54 }
 0xcaa   : > { %2851 = vmatmul.mubr.msk.bf16.vlgmr.msra.gmra.mrb[36].mxu1 %vm889_vm2, %v1889_v56 }
 0xcab   : > { %2864 = vmatprep.mubr.msk.bf16.mxu1 %vm3412_vm1, %v3411_v8  ;;  %2861 = vmatpush3.bf16.msra.mxu1 %v3029_v3 }
 0xcac   : > { %2862 = vmatprep.subr.bf16.mxu1 %v3411_v8 }
 0xcaf   : > { %2863 = vmatpush3.bf16.msra.mxu1 %v3030_v13 }
 0xcb0   : > { %2876 = vmatprep.subr.bf16.mxu1 %v3411_v8 }
 0xccb   : > { %v1878_v57 = vpop.xlane.xlu1 %1877 }
 0xccc   : > { %3079 = vrcp.f32 %v1878_v57 }
 0xccf   : > { %v1658_v58 = vpop.permute.xlu1 %1657 }
 0xcd0   : > { %v2033_v59 = vsel %vm1125_vm3, %v1658_v58, 0 }
 0xcd1   : > { %2855 = vmatpush3.bf16.msra.mxu0 %v2033_v59 }
 0xcd2   : > { %2868 = vmatprep.subr.bf16.mxu0 %v3411_v8 }
 0xcd6   : > { %v3080_v60 = vpop.eup %3079 }
 0xcd7   : > { %v1886_v61 = vmul.f32 %v3080_v60, %v3074_v43 }
 0xcd9   : > { %v1890_v62 = vpack.c.bf16 %v1886_v61, %v1886_v61 }
 0xcdb   : > { %2857 = vmatmul.mubr.msk.bf16.vlgmr.msra.gmra.mrb[48].mxu0 %vm889_vm2, %v1890_v62 }
 0xcdc   : > { %2872 = vmatprep.mubr.msk.bf16.mxu0 %vm3412_vm1, %v3411_v8  ;;  %2869 = vmatpush3.bf16.msra.mxu0 %v3031_v41 }
 0xcdd   : > { %2870 = vmatprep.subr.bf16.mxu0 %v3411_v8 }
 0xce0   : > { %2871 = vmatpush3.bf16.msra.mxu0 %v3032_v42 }
 0xd07   : > { %v1931_v63 = vpop.f32.mrb[32].mxu1 }
 0xd08   : > { %v2840_v0 = vpop.f32.mrb[33].mxu1 }
 0xd09   : > { %v1934_v1 = vpop.f32.mrb[34].mxu1 }
 0xd0a   : > { %v2841_v2 = vpop.f32.mrb[35].mxu1 }
 0xd79   : > { %v1977_v4 = vpop.f32.mrb[44].mxu0 }
 0xd7a   : > { %2076 = vrot.lane.b32.xlu0 %v1977_v4, %s3416_s26  ;;  %v2846_v5 = vpop.f32.mrb[45].mxu0  ;;  %s4295_s26 = sld [smem:[#allocation38_spill]] }
 0xd7b   : > { %v1980_v6 = vpop.f32.mrb[46].mxu0 }
 0xd7c   : > { %v2847_v7 = vpop.f32.mrb[47].mxu0 }
 0xd7d   : > { %v2023_v9 = vpop.f32.mrb[36].mxu1 }
 0xd7e   : > { %2080 = vrot.lane.b32.xlu1 %v2023_v9, %s3417_s25  ;;  %v2852_v10 = vpop.f32.mrb[37].mxu1 }
 0xd7f   : > { %v2026_v11 = vpop.f32.mrb[38].mxu1 }
 0xd80   : > { %v2853_v12 = vpop.f32.mrb[39].mxu1  ;;  %v2623_v59 = vld [vmem:[%s4295_s26] ss:$0 sm:$0xff] }
 0xd81   : > { %v2627_v11 = vld [vmem:[%s4296_s28] ss:$0 sm:$0xff] }
 0xdae   : > { %v2069_v14 = vpop.f32.mrb[48].mxu0 }
 0xdaf   : > { %2084 = vrot.lane.b32.xlu0 %v2069_v14, %s3418_s12  ;;  %v2858_v16 = vpop.f32.mrb[49].mxu0  ;;  %s4294_s12 = sld [smem:[#allocation39_spill]] }
 0xdb0   : > { %v2072_v19 = vpop.f32.mrb[50].mxu0 }
 0xdb1   : > { %v2859_v20 = vpop.f32.mrb[51].mxu0 }
 0xdb5   : > { %v3034_v51 = vld [vmem:[%s4294_s12 + $0x8] sm:$0xff]   ;;  %v3035_v15 = vld [vmem:[%s4294_s12 + $0x10] sm:$0xff]   ;;  %v3036_v17 = vld [vmem:[%s4294_s12 + $0x18] sm:$0xff]  }
 0xdb6   : > { %v3037_v54 = vld [vmem:[%s4294_s12 + $0x20] sm:$0xff]   ;;  %v3038_v56 = vld [vmem:[%s4294_s12 + $0x28] sm:$0xff]   ;;  %v3039_v57 = vld [vmem:[%s4294_s12 + $0x30] sm:$0xff]  }
 0xdb7   : > { %v3040_v58 = vld [vmem:[%s4294_s12 + $0x38] sm:$0xff]  }
 0xdec   : > { %v2077_v21 = vpop.permute.xlu0 %2076 }
 0xded   : > { %v2087_v24 = vsel %vm889_vm2, %v1931_v63, %v2077_v21 }
 0xdf0   : > { %v2081_v22 = vpop.permute.xlu1 %2080 }
 0xdf1   : > { %v2088_v25 = vsel %vm1320_vm4, %v2087_v24, %v2081_v22 }
 0xe21   : > { %v2085_v26 = vpop.permute.xlu0 %2084 }
 0xe22   : > { %v2089_v27 = vsel %vm1322_vm5, %v2088_v25, %v2085_v26 }
 0xe23   : > { %v2090_v28 = vpack.c.bf16 %v2089_v27, %v2089_v27 }
 0xe25   : > { %2865 = vmatmul.mubr.msk.bf16.vlgmr.msra.gmra.mrb[40].mxu1 %vm661_vm0, %v2090_v28 }
 0xe26   : > { %2892 = vmatprep.mubr.msk.bf16.mxu1 %vm3412_vm1, %v3411_v8 }
 0xef8   : > { %v2146_v30 = vpop.f32.mrb[40].mxu1 }
 0xef9   : > { %v2147_v55 = vadd.f32 %v2619_v29, %v2146_v30  ;;  %v2866_v31 = vpop.f32.mrb[41].mxu1 }
 0xefa   : > { %v2149_v32 = vpop.f32.mrb[42].mxu1 }
 0xefb   : > { %v4095_v33 = vadd.f32 %v2147_v55, %v3995_v18  ;;  %v2867_v34 = vpop.f32.mrb[43].mxu1  ;;  %v3033_v18 = vld [vmem:[%s4294_s12] sm:$0xff]  }
 0xefc   : > { %2877 = vmatpush3.bf16.msra.mxu1 %v3033_v18 }
 0xefd   : > { %v2153_v35 = vsel %vm661_vm0, %v4095_v33, 0.0  ;;  %2878 = vmatprep.subr.bf16.mxu1 %v3411_v8 }
 0xefe   : > { %2154 = vadd.xlane.f32.xlu1 %v2153_v35 }
 0xf00   : > { %2879 = vmatpush3.bf16.msra.mxu1 %v3034_v51 }
 0xf01   : > { %2880 = vmatprep.subr.bf16.mxu1 %v3411_v8 }
 0xf04   : > { %2881 = vmatpush3.bf16.msra.mxu1 %v3035_v15 }
 0xf05   : > { %2882 = vmatprep.subr.bf16.mxu1 %v3411_v8 }
 0xf08   : > { %2883 = vmatpush3.bf16.msra.mxu1 %v3036_v17 }
 0xf09   : > { %2884 = vmatprep.subr.bf16.mxu1 %v3411_v8 }
 0xf0c   : > { %2885 = vmatpush3.bf16.msra.mxu1 %v3037_v54 }
 0xf0d   : > { %2886 = vmatprep.subr.bf16.mxu1 %v3411_v8 }
 0xf10   : > { %2887 = vmatpush3.bf16.msra.mxu1 %v3038_v56 }
 0xf11   : > { %2888 = vmatprep.subr.bf16.mxu1 %v3411_v8 }
 0xf14   : > { %2889 = vmatpush3.bf16.msra.mxu1 %v3039_v57 }
 0xf15   : > { %2890 = vmatprep.subr.bf16.mxu1 %v3411_v8 }
 0xf18   : > { %2891 = vmatpush3.bf16.msra.mxu1 %v3040_v58 }
 0xf8b   : > { %v2155_v36 = vpop.xlane.xlu1 %2154 }
 0xf8c   : > { %v2156_v37 = vmul.f32 0.03125, %v2155_v36 }
 0xf8e   : > { %v2157_v38 = vsub.f32 %v4095_v33, %v2156_v37 }
 0xf90   : > { %v2158_v39 = vmul.f32 %v2157_v38, %v2157_v38 }
 0xf92   : > { %v2159_v40 = vsel %vm661_vm0, %v2158_v39, 0.0 }
 0xf93   : > { %2160 = vadd.xlane.f32.xlu0 %v2159_v40 }
0x1020   : > { %v2161_v43 = vpop.xlane.xlu0 %2160 }
0x1021   : > { %v2162_v44 = vmul.f32 0.03125, %v2161_v43 }
0x1023   : > { %v2163_v45 = vadd.f32 1e-05, %v2162_v44 }
0x1025   : > { %3081 = vrsqrt.f32 %v2163_v45 }
0x102f   : > { %v3082_v47 = vpop.eup %3081 }
0x1030   : > { %v2165_v48 = vmul.f32 %v3082_v47, %v2157_v38 }
0x1032   : > { %v2170_v52 = vmul.f32 %v2169_v46, %v2165_v48 }
0x1034   : > { %v2175_v53 = vadd.f32 %v2174_v49, %v2170_v52 }
0x1036   : > { %v2176_v50 = vpack.c.bf16 %v2175_v53, %v2175_v53 }
0x1038   : > { %2873 = vmatmul.mubr.msk.bf16.vlgmr.msra.gmra.mrb[52].mxu0 %vm661_vm0, %v2176_v50 }
0x110b   : > { %v2237_v60 = vpop.f32.mrb[52].mxu0 }
0x110c   : > { %v2238_v61 = vadd.f32 %v2623_v59, %v2237_v60  ;;  %v2874_v62 = vpop.f32.mrb[53].mxu0 }
0x110d   : > { %v2240_v63 = vpop.f32.mrb[54].mxu0 }
0x110e   : > { %v2244_v0 = vmul.f32 0.044715, %v2238_v61  ;;  %v2875_v1 = vpop.f32.mrb[55].mxu0  ;;  %v2243_v8 = vmul.f32 0.5, %v2238_v61 }
0x1110   : > { %v2245_v2 = vmul.f32 %v2244_v0, %v2238_v61 }
0x1112   : > { %v2246_v3 = vmul.f32 %v2245_v2, %v2238_v61 }
0x1114   : > { %v2247_v4 = vadd.f32 %v2246_v3, %v2238_v61 }
0x1116   : > { %v2248_v5 = vmul.f32 0.7978846, %v2247_v4 }
0x1118   : > { %3083 = vtanh.f32 %v2248_v5 }
0x1122   : > { %v3084_v6 = vpop.eup %3083 }
0x1123   : > { %v2250_v7 = vadd.f32 1.0, %v3084_v6 }
0x1125   : > { %v2251_v9 = vmul.f32 %v2250_v7, %v2243_v8 }
0x1127   : > { %v2252_v10 = vpack.c.bf16 %v2251_v9, %v2251_v9 }
0x1129   : > { %2893 = vmatmul.mubr.bf16.vlgmr.msra.gmra.mrb[44].mxu1 %v2252_v10 }
0x11fc   : > { %v2358_v12 = vpop.f32.mrb[44].mxu1 }
0x11fd   : > { %v2359_v13 = vadd.f32 %v2627_v11, %v2358_v12  ;;  %v2894_v14 = vpop.f32.mrb[45].mxu1 }
0x11fe   : > { %v2361_v16 = vpop.f32.mrb[46].mxu1 }
0x11ff   : > { %v2364_v19 = vadd.f32 %v2359_v13, %v4095_v33  ;;  %v2895_v20 = vpop.f32.mrb[47].mxu1 }
0x1201   : > { %2365 = vst.msk [vmem:[%s651_s5] sm:$0xff] %vm661_vm0, %v2364_v19 }
0x1202   : > { %3328 = shalt.err (!%p3325_p2)
}
0x1203   : > { %s3329_s30 = scalar_lea.hbm %s4148_s8, 128  ;;  %s3333_s27 = scalar_lea.hbm %s4298_s22, 256 }
0x1204   : > { %p3330_p4 = scmp.ne.s32.totalorder %s4148_s8, %s3329_s30  ;;  %p3334_p10 = scmp.lt.u32.totalorder %s4148_s8, %s4298_s22 }
0x1205   : > { %p3335_p12 = scmp.lt.u32.totalorder %s3333_s27, %s3329_s30  ;;  %p3337_p7 = scmp.lt.u32.totalorder %s3329_s30, %s4148_s8 }
0x1206   : > { %p3331_p9 = pnand %p3330_p4, %p4299_p8 }
0x1207   : > { %p3336_p6 = por %p3335_p12, %p3334_p10 }
0x1208   : > { %p3332_p1 = pneg %p3331_p9 }
0x1209   : > { %p3338_p11 = por %p3337_p7, %p3336_p6 }
0x120b   : > { %p3339_p5 = pnand %p3338_p11, %p3332_p1 }
0x120d   : > { %3342 = shalt.err (!%p3339_p5)
}
0x120e   : > { %2922 = dma.vmem_to_hbm [thread:$0]  (%p4299_p8), %s4150_s6, 128, %s4148_s8, %s2367_s13  }
0x120f PF: > { %s4300_s15 = sld [smem:[#allocation23_spill]]  ;;  %s4301_s28 = sld [smem:[#allocation30_spill]] }
0x1210   : > { %s4302_s29 = sld [smem:[#allocation24_spill]] }
0x1215   : > { %s2392_s5 = sand.u32 1, %s4300_s15   ;;  %p4303_p0 = scmp.ne.s32.totalorder %s4301_s28, 0 }
0x1216   : > { %p4304_p13 = scmp.ge.s32.totalorder %s4302_s29, 2  ;;  %s2393_s7 = scalar_lea.sflag [#allocation4], %s2392_s5 }
0x1218   : > { %p2951_p3 = pnand %p4304_p13, %p4303_p0 }
0x121a   : > { %3380 = dma.done.wait (!%p2951_p3), %s2393_s7, 128  }
0x121b   : > { %3382 = vsyncadd (!%p2951_p3), %s2393_s7, 4294967168  ;;  %s4305_s21 = sld [smem:[#allocation26_spill]]  ;;  %s4306_s24 = sld [smem:[#allocation27_spill]] }
0x121c   : > { %s4307_s18 = smov %s3389_s19  ;;  %s4308_s19 = smov %s3393_s20 }
0x1221   : > { %p34_p2 = scmp.ge.s32.totalorder %s4305_s21, 4   ;;  %s4309_s20 = smov %s4306_s24 }
0x1223   :  { %36 = sbr.rel (!%p34_p2) target bundleno = 22 (0x16), region = 173 }
0x122a   :  { %2398 = vsyncpa [#allocation3], 1 }
0x122b   :  { %2400 = vsyncpa [#allocation3 + $0x1], 1 }
0x122c   :  { %2401 = vsyncpa [#allocation6], 1 }
0x122d   :  { %2403 = vsyncpa [#allocation6 + $0x1], 1 }
0x122e   :  { %2404 = vsyncpa [#allocation9], 1 }
0x122f   :  { %2405 = vsyncpa [#allocation12], 1 }
0x1230   :  { %2406 = vsyncpa [#allocation15], 1 }
0x1231   :  { %2407 = vsyncpa [#allocation4], 1 }
0x1232   :  { %2409 = vsyncpa [#allocation4 + $0x1], 1 }

</bundles_post_ra>
